<compile_context>
chip_gen: v7x
topology: tpu7x:2x2x1
jax: 0.10.0
libtpu: 0.0.40
codegen_flags: <defaults>
</compile_context>

<pallas_src>
import functools

import jax
import jax.numpy as jnp
from jax import lax
from jax.experimental import pallas as pl
from jax.experimental.pallas import tpu as pltpu


# ----------------------------- small helpers -------------------------------

def _round_up(x, m):
    return ((x + m - 1) // m) * m


def _largest_divisor(n, cap):
    cap = max(1, min(n, cap))
    for d in range(cap, 0, -1):
        if n % d == 0:
            return d
    return 1


def _largest_divisor_mult(n, cap, mult):
    """Largest divisor of n that is <= cap and a multiple of `mult`."""
    cap = max(1, min(n, cap))
    for d in range(cap, 0, -1):
        if n % d == 0 and d % mult == 0:
            return d
    return n


def _num_tensorcores():
    """Best-effort: >1 only for TPU generations exposing 2 TensorCores per chip
    to a single Pallas grid (v7x-class).  Defaults to 1 (v5e/v6e/CPU)."""
    try:
        kind = (getattr(jax.devices()[0], "device_kind", "") or "").lower()
    except Exception:
        return 1
    return 2 if "v7" in kind else 1


_GX_VMEM_BUDGET = 24 * 1024 * 1024   # conservative: fits v7x 64 MiB & v5e scoped


def _pick_tiles(B_pad, T, H_pad, C, gx_bytes, mm_bytes, n_tc):
    """VMEM-budget-aware batch/time tiles."""
    # Batch blocking: split only when multiple TensorCores can take the blocks.
    if n_tc > 1 and B_pad >= 16:
        b_cap = max(8, B_pad // n_tc)
    else:
        b_cap = B_pad
    b_blk = _largest_divisor_mult(B_pad, b_cap, 8)

    fixed = (2 * (H_pad * 4 * H_pad + H_pad * C) * mm_bytes   # double-buffered weights
             + 2 * C * 4                                      # bias (1, C)
             + 2 * b_blk * C * 4                              # output double buffer
             + 2 * b_blk * H_pad * 4)                         # h/c f32 scratch
    per_t = 2 * b_blk * 4 * H_pad * gx_bytes                  # gx double buffer per step
    t_cap = max(1, (_GX_VMEM_BUDGET - fixed) // per_t)
    t_blk = _largest_divisor(T, min(t_cap, 256))
    vmem_need = fixed + t_blk * per_t
    return b_blk, t_blk, vmem_need


def _pick_unroll(b_blk, H_pad, t_blk):
    """Adaptive unroll: avoid vreg-pressure blowup when the per-step live set
    (gates + act in f32) is large."""
    live = 2 * b_blk * 4 * H_pad * 4
    if live <= 64 * 1024:
        u = 8
    elif live <= 192 * 1024:
        u = 4
    else:
        u = 2
    return max(1, min(t_blk, u))


# --------------------------------- kernel ----------------------------------

def lstm_kernel(gx_ref, w_hh_ref, w_fc_ref, b_fc_ref, out_ref, h_ref, c_ref,
                *, t_block, hidden_size, unroll):
    """gx_ref: (T_BLK, B_BLK, 4H) precomputed input-projection gates (time-major,
    g-gate columns pre-scaled by 2); bf16 on TPU, f32 otherwise.
    w_hh: (H, 4H); w_fc: (H, C) (matmul dtype); b_fc: (1, C) f32.
    out: (B_BLK, C) f32.  h/c scratch: (B_BLK, H) f32, carried across the
    "arbitrary" time-block grid axis."""
    H = hidden_size
    t_idx = pl.program_id(1)

    @pl.when(t_idx == 0)
    def _():
        h_ref[...] = jnp.zeros_like(h_ref)
        c_ref[...] = jnp.zeros_like(c_ref)

    # Loop-invariant (1, 4H) fixup rows: tanh(g) == 2*sigmoid(2g) - 1; the x2
    # was folded into the g-gate weights/bias in the wrapper, so one full-width
    # sigmoid + a cheap VPU multiply-add yields all four activations.
    col = lax.broadcasted_iota(jnp.int32, (1, 4 * H), 1)
    is_g = (col >= 2 * H) & (col < 3 * H)
    mul_fix = jnp.where(is_g, 2.0, 1.0).astype(jnp.float32)    # (1, 4H)
    add_fix = jnp.where(is_g, -1.0, 0.0).astype(jnp.float32)   # (1, 4H)

    mm_dtype = w_hh_ref.dtype

    def step(i, carry):
        # Only the recurrent matmul sits on the serial critical path; the input
        # projection + bias were hoisted into one big matmul in the wrapper.
        gates = gx_ref[i].astype(jnp.float32) + jnp.dot(
            h_ref[...].astype(mm_dtype), w_hh_ref[...],
            preferred_element_type=jnp.float32)                 # (B, 4H) f32
        s = jax.nn.sigmoid(gates)                               # single EUP pass
        act = s * mul_fix + add_fix
        i_g = act[:, 0 * H:1 * H]
        f_g = act[:, 1 * H:2 * H]
        g_g = act[:, 2 * H:3 * H]
        o_g = act[:, 3 * H:4 * H]
        c_new = f_g * c_ref[...] + i_g * g_g
        h_ref[...] = o_g * jnp.tanh(c_new)
        c_ref[...] = c_new
        return carry

    lax.fori_loop(0, t_block, step, 0, unroll=unroll)

    # fc(output[:, -1, :]) == fc(h_T); dropout is identity in eval mode.
    @pl.when(t_idx == pl.num_programs(1) - 1)
    def _():
        out_ref[...] = (jnp.dot(h_ref[...].astype(mm_dtype), w_fc_ref[...],
                                preferred_element_type=jnp.float32)
                        + b_fc_ref[...])


# -------------------------------- wrapper -----------------------------------

def lstm_forward(x, w_ih, w_hh, b_ih, b_hh, w_fc, b_fc):
    """x: (B, T, D) float32 (batch_first).  Returns (B, num_classes) float32.
    Matches nn.LSTM(num_layers=1, batch_first=True) + Dropout(eval) + Linear."""
    B, T, D = x.shape
    H = w_hh.shape[1]          # w_hh: (4H, H)
    C = w_fc.shape[0]          # w_fc: (C, H)

    on_tpu = jax.default_backend() == "tpu"
    # bf16 matmul operands on TPU (MXU); plain f32 on other backends, which
    # reject bf16 x bf16 -> f32 dots.  Accumulation / state / gating stay f32.
    mm_dtype = jnp.bfloat16 if on_tpu else jnp.float32
    gx_dtype = mm_dtype
    mm_bytes = jnp.dtype(mm_dtype).itemsize
    gx_bytes = jnp.dtype(gx_dtype).itemsize

    # Pad B to a multiple of 8 (sublanes) and H to a multiple of 128 so the
    # four gate slices are lane-aligned.  Padded gate columns carry zero
    # weights and zero bias, so padded h/c lanes stay exactly 0.
    B_pad = _round_up(B, 8)
    H_pad = _round_up(H, 128)

    bias = (b_ih + b_hh).astype(jnp.float32)                       # (4H,)

    # Fold the x2 of tanh(g) = 2*sigmoid(2g) - 1 into the g-gate parameters.
    w_ih = w_ih.at[2 * H:3 * H, :].multiply(2.0)
    w_hh = w_hh.at[2 * H:3 * H, :].multiply(2.0)
    bias = bias.at[2 * H:3 * H].multiply(2.0)

    # Per-gate-block padding (PyTorch gate order i, f, g, o along the 4H axis).
    w_ih_p = jnp.zeros((4 * H_pad, D), jnp.float32)
    w_hh_p = jnp.zeros((4 * H_pad, H_pad), jnp.float32)
    bias_p = jnp.zeros((4 * H_pad,), jnp.float32)
    for g in range(4):
        w_ih_p = w_ih_p.at[g * H_pad:g * H_pad + H, :].set(w_ih[g * H:(g + 1) * H, :])
        w_hh_p = w_hh_p.at[g * H_pad:g * H_pad + H, :H].set(w_hh[g * H:(g + 1) * H, :])
        bias_p = bias_p.at[g * H_pad:g * H_pad + H].set(bias[g * H:(g + 1) * H])
    w_fc_p = jnp.zeros((C, H_pad), jnp.float32).at[:, :H].set(w_fc)

    x_p = x if B_pad == B else jnp.pad(x, ((0, B_pad - B), (0, 0), (0, 0)))

    w_ih_t = jnp.transpose(w_ih_p).astype(mm_dtype)                # (D, 4Hp)
    w_hh_t = jnp.transpose(w_hh_p).astype(mm_dtype)                # (Hp, 4Hp)
    w_fc_t = jnp.transpose(w_fc_p).astype(mm_dtype)                # (Hp, C)
    b_fc2 = b_fc.astype(jnp.float32)[None, :]                      # (1, C)

    # Hoisted input projection: one (T*B, D) @ (D, 4Hp) contraction, emitted
    # directly time-major; stored narrow (bf16 on TPU) to halve the dominant
    # HBM stream and the gx double buffer.
    gates_x = (jnp.einsum('btd,dg->tbg', x_p.astype(mm_dtype), w_ih_t,
                          preferred_element_type=jnp.float32)
               + bias_p).astype(gx_dtype)                          # (T, Bp, 4Hp)

    n_tc = _num_tensorcores()
    B_BLK, T_BLK, vmem_need = _pick_tiles(B_pad, T, H_pad, C, gx_bytes,
                                          mm_bytes, n_tc)
    unroll = _pick_unroll(B_BLK, H_pad, T_BLK)
    grid = (B_pad // B_BLK, T // T_BLK)

    kernel = functools.partial(lstm_kernel, t_block=T_BLK, hidden_size=H_pad,
                               unroll=unroll)

    flops = 2 * T * B_pad * 4 * H_pad * H_pad + 2 * B_pad * H_pad * C
    transc = T * B_pad * (4 * H_pad + H_pad)
    bytes_acc = (T * B_pad * 4 * H_pad * gx_bytes
                 + H_pad * 4 * H_pad * mm_bytes + H_pad * C * mm_bytes
                 + C * 4 + B_pad * C * 4)

    vmem_limit = int(min(max(vmem_need + 4 * 1024 * 1024, 32 * 1024 * 1024),
                         48 * 1024 * 1024))

    out_p = pl.pallas_call(
        kernel,
        out_shape=jax.ShapeDtypeStruct((B_pad, C), jnp.float32),
        grid_spec=pltpu.PrefetchScalarGridSpec(
            num_scalar_prefetch=0,
            grid=grid,
            in_specs=[
                pl.BlockSpec((T_BLK, B_BLK, 4 * H_pad), lambda b, t: (t, b, 0)),
                pl.BlockSpec((H_pad, 4 * H_pad), lambda b, t: (0, 0)),
                pl.BlockSpec((H_pad, C), lambda b, t: (0, 0)),
                pl.BlockSpec((1, C), lambda b, t: (0, 0)),
            ],
            out_specs=pl.BlockSpec((B_BLK, C), lambda b, t: (b, 0)),
            scratch_shapes=[pltpu.VMEM((B_BLK, H_pad), jnp.float32),
                            pltpu.VMEM((B_BLK, H_pad), jnp.float32)],
        ),
        compiler_params=pltpu.CompilerParams(
            dimension_semantics=("parallel", "arbitrary"),
            vmem_limit_bytes=vmem_limit),
        cost_estimate=pl.CostEstimate(flops=flops, transcendentals=transc,
                                      bytes_accessed=bytes_acc),
    )(gates_x, w_hh_t, w_fc_t, b_fc2)

    return out_p[:B]


# ------------------------------- reference ----------------------------------

def lstm_reference(x, w_ih, w_hh, b_ih, b_hh, w_fc, b_fc):
    """Pure-JAX f32 reference matching nn.LSTM(batch_first=True) + Linear."""
    B, T, D = x.shape
    H = w_hh.shape[1]

    def step(carry, x_t):
        h, c = carry
        gates = x_t @ w_ih.T + h @ w_hh.T + b_ih + b_hh
        i = jax.nn.sigmoid(gates[:, 0 * H:1 * H])
        f = jax.nn.sigmoid(gates[:, 1 * H:2 * H])
        g = jnp.tanh(gates[:, 2 * H:3 * H])
        o = jax.nn.sigmoid(gates[:, 3 * H:4 * H])
        c = f * c + i * g
        h = o * jnp.tanh(c)
        return (h, c), h

    h0 = jnp.zeros((B, H), jnp.float32)
    c0 = jnp.zeros((B, H), jnp.float32)
    (h_T, _), _ = lax.scan(step, (h0, c0), jnp.transpose(x, (1, 0, 2)))
    return h_T @ w_fc.T + b_fc


if __name__ == "__main__":
    # Small shapes implied by the module's forward: x is (batch, seq, input_size)
    B, T, INPUT, HIDDEN, NUM_CLASSES = 4, 8, 16, 32, 8

    key = jax.random.PRNGKey(0)
    kx, k1, k2, k3, k4, k5, k6 = jax.random.split(key, 7)

    x = jax.random.normal(kx, (B, T, INPUT), jnp.float32)

    # Deterministic parameter init, PyTorch-style uniform(-1/sqrt(H), 1/sqrt(H))
    s = 1.0 / jnp.sqrt(jnp.float32(HIDDEN))
    w_ih = jax.random.uniform(k1, (4 * HIDDEN, INPUT), jnp.float32, -s, s)
    w_hh = jax.random.uniform(k2, (4 * HIDDEN, HIDDEN), jnp.float32, -s, s)
    b_ih = jax.random.uniform(k3, (4 * HIDDEN,), jnp.float32, -s, s)
    b_hh = jax.random.uniform(k4, (4 * HIDDEN,), jnp.float32, -s, s)
    w_fc = jax.random.uniform(k5, (NUM_CLASSES, HIDDEN), jnp.float32, -s, s)
    b_fc = jax.random.uniform(k6, (NUM_CLASSES,), jnp.float32, -s, s)

    out = lstm_forward(x, w_ih, w_hh, b_ih, b_hh, w_fc, b_fc)
    out = jax.block_until_ready(out)

    ref = lstm_reference(x, w_ih, w_hh, b_ih, b_hh, w_fc, b_fc)
    assert out.shape == (B, NUM_CLASSES)
    # On TPU the matmul operands / gate stream are bf16 (f32 accumulation),
    # so the comparison against the all-f32 reference uses a loose tolerance.
    assert jnp.allclose(out, ref, atol=5e-2, rtol=5e-2), "mismatch vs reference"

    print("KERNEL_OK")
</pallas_src>

<mosaic_0001>
module attributes {stable_mosaic.version = 11 : i64} {
  func.func @lstm_kernel(%arg0: i32, %arg1: i32, %arg2: memref<8x8x512xf32, #tpu.memory_space<vmem>>, %arg3: memref<128x512xf32, #tpu.memory_space<vmem>>, %arg4: memref<128x8xf32, #tpu.memory_space<vmem>>, %arg5: memref<1x8xf32, #tpu.memory_space<vmem>>, %arg6: memref<8x8xf32, #tpu.memory_space<vmem>>, %arg7: memref<8x128xf32, #tpu.memory_space<vmem>>, %arg8: memref<8x128xf32, #tpu.memory_space<vmem>>) attributes {dimension_semantics = [#tpu.dimension_semantics<parallel>, #tpu.dimension_semantics<arbitrary>], iteration_bounds = array<i64: 1, 1>, scalar_prefetch = 0 : i64, scratch_operands = 2 : i64, tpu.core_type = #tpu.core_type<tc>, window_params = [{transform_indices = @transform_0, window_bounds = array<i64: 8, 8, 512>}, {pipeline_mode = #tpu.pipeline_mode<synchronous>, transform_indices = @transform_1, window_bounds = array<i64: 128, 512>}, {pipeline_mode = #tpu.pipeline_mode<synchronous>, transform_indices = @transform_2, window_bounds = array<i64: 128, 8>}, {pipeline_mode = #tpu.pipeline_mode<synchronous>, transform_indices = @transform_3, window_bounds = array<i64: 1, 8>}, {transform_indices = @transform_4, window_bounds = array<i64: 8, 8>}]} {
    %c0_i32 = arith.constant 0 : i32
    %0 = arith.cmpi eq, %arg1, %c0_i32 : i32
    %1 = arith.extui %0 : i1 to i32
    %c0_i32_0 = arith.constant 0 : i32
    %2 = arith.cmpi ne, %1, %c0_i32_0 : i32
    scf.if %2 {
      %cst_118 = arith.constant 0.000000e+00 : f32
      %242 = vector.broadcast %cst_118 : f32 to vector<8x128xf32>
      %c0_119 = arith.constant 0 : index
      %c0_120 = arith.constant 0 : index
      %243 = vector.load %arg7[%c0_119, %c0_120] : memref<8x128xf32, #tpu.memory_space<vmem>>, vector<8x128xf32>
      tpu.vector_store %arg7[%c0_119, %c0_120], %242 {strides = array<i32>} : memref<8x128xf32, #tpu.memory_space<vmem>>, vector<8x128xf32>,
      %cst_121 = arith.constant 0.000000e+00 : f32
      %244 = vector.broadcast %cst_121 : f32 to vector<8x128xf32>
      %c0_122 = arith.constant 0 : index
      %c0_123 = arith.constant 0 : index
      %245 = vector.load %arg8[%c0_122, %c0_123] : memref<8x128xf32, #tpu.memory_space<vmem>>, vector<8x128xf32>
      tpu.vector_store %arg8[%c0_122, %c0_123], %244 {strides = array<i32>} : memref<8x128xf32, #tpu.memory_space<vmem>>, vector<8x128xf32>,
    } else {
    }
    %3 = tpu.iota {dimensions = array<i32: 1>} : vector<1x512xi32>
    %c256_i32 = arith.constant 256 : i32
    %4 = vector.broadcast %c256_i32 : i32 to vector<1x512xi32>
    %5 = arith.cmpi sge, %3, %4 : vector<1x512xi32>
    %c384_i32 = arith.constant 384 : i32
    %6 = vector.broadcast %c384_i32 : i32 to vector<1x512xi32>
    %7 = arith.cmpi slt, %3, %6 : vector<1x512xi32>
    %8 = arith.andi %5, %7 : vector<1x512xi1>
    %cst = arith.constant 2.000000e+00 : f32
    %cst_1 = arith.constant 1.000000e+00 : f32
    %9 = vector.broadcast %cst : f32 to vector<1x512xf32>
    %10 = vector.broadcast %cst_1 : f32 to vector<1x512xf32>
    %11 = arith.select %8, %9, %10 : vector<1x512xi1>, vector<1x512xf32>
    %cst_2 = arith.constant -1.000000e+00 : f32
    %cst_3 = arith.constant 0.000000e+00 : f32
    %12 = vector.broadcast %cst_2 : f32 to vector<1x512xf32>
    %13 = vector.broadcast %cst_3 : f32 to vector<1x512xf32>
    %14 = arith.select %8, %12, %13 : vector<1x512xi1>, vector<1x512xf32>
    %c0_i32_4 = arith.constant 0 : i32
    %15 = arith.index_cast %c0_i32_4 : i32 to index
    %c0 = arith.constant 0 : index
    %c0_5 = arith.constant 0 : index
    %16 = vector.load %arg2[%15, %c0, %c0_5] : memref<8x8x512xf32, #tpu.memory_space<vmem>>, vector<1x8x512xf32>
    %17 = vector.shape_cast %16 : vector<1x8x512xf32> to vector<8x512xf32>
    %c0_6 = arith.constant 0 : index
    %c0_7 = arith.constant 0 : index
    %18 = vector.load %arg7[%c0_6, %c0_7] : memref<8x128xf32, #tpu.memory_space<vmem>>, vector<8x128xf32>
    %c0_8 = arith.constant 0 : index
    %c0_9 = arith.constant 0 : index
    %19 = vector.load %arg3[%c0_8, %c0_9] : memref<128x512xf32, #tpu.memory_space<vmem>>, vector<128x512xf32>
    %cst_10 = arith.constant dense<0.000000e+00> : vector<8x512xf32>
    %20 = tpu.matmul %18, %19, %cst_10 {dimension_numbers = #tpu.dot_dimension_numbers<[1], [0], [0], [1], [0, 0, 1, 1], [], []>} : vector<8x128xf32>, vector<128x512xf32>, vector<8x512xf32> -> vector<8x512xf32>
    %21 = arith.addf %17, %20 : vector<8x512xf32>
    %22 = arith.negf %21 : vector<8x512xf32>
    %23 = math.exp %22 : vector<8x512xf32>
    %cst_11 = arith.constant 1.000000e+00 : f32
    %24 = vector.broadcast %cst_11 : f32 to vector<8x512xf32>
    %25 = arith.addf %24, %23 : vector<8x512xf32>
    %26 = arith.divf %24, %25 : vector<8x512xf32>
    %27 = vector.broadcast %11 : vector<1x512xf32> to vector<8x512xf32>
    %28 = arith.mulf %26, %27 : vector<8x512xf32>
    %29 = vector.broadcast %14 : vector<1x512xf32> to vector<8x512xf32>
    %30 = arith.addf %28, %29 : vector<8x512xf32>
    %31 = vector.extract_strided_slice %30 {offsets = [0, 0], sizes = [8, 128], strides = [1, 1]} : vector<8x512xf32> to vector<8x128xf32>
    %32 = vector.extract_strided_slice %30 {offsets = [0, 128], sizes = [8, 128], strides = [1, 1]} : vector<8x512xf32> to vector<8x128xf32>
    %33 = vector.extract_strided_slice %30 {offsets = [0, 256], sizes = [8, 128], strides = [1, 1]} : vector<8x512xf32> to vector<8x128xf32>
    %34 = vector.extract_strided_slice %30 {offsets = [0, 384], sizes = [8, 128], strides = [1, 1]} : vector<8x512xf32> to vector<8x128xf32>
    %c0_12 = arith.constant 0 : index
    %c0_13 = arith.constant 0 : index
    %35 = vector.load %arg8[%c0_12, %c0_13] : memref<8x128xf32, #tpu.memory_space<vmem>>, vector<8x128xf32>
    %36 = arith.mulf %32, %35 : vector<8x128xf32>
    %37 = arith.mulf %31, %33 : vector<8x128xf32>
    %38 = arith.addf %36, %37 : vector<8x128xf32>
    %39 = math.tanh %38 : vector<8x128xf32>
    %40 = arith.mulf %34, %39 : vector<8x128xf32>
    %c0_14 = arith.constant 0 : index
    %c0_15 = arith.constant 0 : index
    %41 = vector.load %arg7[%c0_14, %c0_15] : memref<8x128xf32, #tpu.memory_space<vmem>>, vector<8x128xf32>
    tpu.vector_store %arg7[%c0_14, %c0_15], %40 {strides = array<i32>} : memref<8x128xf32, #tpu.memory_space<vmem>>, vector<8x128xf32>,
    %c0_16 = arith.constant 0 : index
    %c0_17 = arith.constant 0 : index
    %42 = vector.load %arg8[%c0_16, %c0_17] : memref<8x128xf32, #tpu.memory_space<vmem>>, vector<8x128xf32>
    tpu.vector_store %arg8[%c0_16, %c0_17], %38 {strides = array<i32>} : memref<8x128xf32, #tpu.memory_space<vmem>>, vector<8x128xf32>,
    %c1_i32 = arith.constant 1 : i32
    %43 = arith.index_cast %c1_i32 : i32 to index
    %c0_18 = arith.constant 0 : index
    %c0_19 = arith.constant 0 : index
    %44 = vector.load %arg2[%43, %c0_18, %c0_19] : memref<8x8x512xf32, #tpu.memory_space<vmem>>, vector<1x8x512xf32>
    %45 = vector.shape_cast %44 : vector<1x8x512xf32> to vector<8x512xf32>
    %c0_20 = arith.constant 0 : index
    %c0_21 = arith.constant 0 : index
    %46 = vector.load %arg7[%c0_20, %c0_21] : memref<8x128xf32, #tpu.memory_space<vmem>>, vector<8x128xf32>
    %c0_22 = arith.constant 0 : index
    %c0_23 = arith.constant 0 : index
    %47 = vector.load %arg3[%c0_22, %c0_23] : memref<128x512xf32, #tpu.memory_space<vmem>>, vector<128x512xf32>
    %cst_24 = arith.constant dense<0.000000e+00> : vector<8x512xf32>
    %48 = tpu.matmul %46, %47, %cst_24 {dimension_numbers = #tpu.dot_dimension_numbers<[1], [0], [0], [1], [0, 0, 1, 1], [], []>} : vector<8x128xf32>, vector<128x512xf32>, vector<8x512xf32> -> vector<8x512xf32>
    %49 = arith.addf %45, %48 : vector<8x512xf32>
    %50 = arith.negf %49 : vector<8x512xf32>
    %51 = math.exp %50 : vector<8x512xf32>
    %cst_25 = arith.constant 1.000000e+00 : f32
    %52 = vector.broadcast %cst_25 : f32 to vector<8x512xf32>
    %53 = arith.addf %52, %51 : vector<8x512xf32>
    %54 = arith.divf %52, %53 : vector<8x512xf32>
    %55 = vector.broadcast %11 : vector<1x512xf32> to vector<8x512xf32>
    %56 = arith.mulf %54, %55 : vector<8x512xf32>
    %57 = vector.broadcast %14 : vector<1x512xf32> to vector<8x512xf32>
    %58 = arith.addf %56, %57 : vector<8x512xf32>
    %59 = vector.extract_strided_slice %58 {offsets = [0, 0], sizes = [8, 128], strides = [1, 1]} : vector<8x512xf32> to vector<8x128xf32>
    %60 = vector.extract_strided_slice %58 {offsets = [0, 128], sizes = [8, 128], strides = [1, 1]} : vector<8x512xf32> to vector<8x128xf32>
    %61 = vector.extract_strided_slice %58 {offsets = [0, 256], sizes = [8, 128], strides = [1, 1]} : vector<8x512xf32> to vector<8x128xf32>
    %62 = vector.extract_strided_slice %58 {offsets = [0, 384], sizes = [8, 128], strides = [1, 1]} : vector<8x512xf32> to vector<8x128xf32>
    %c0_26 = arith.constant 0 : index
    %c0_27 = arith.constant 0 : index
    %63 = vector.load %arg8[%c0_26, %c0_27] : memref<8x128xf32, #tpu.memory_space<vmem>>, vector<8x128xf32>
    %64 = arith.mulf %60, %63 : vector<8x128xf32>
    %65 = arith.mulf %59, %61 : vector<8x128xf32>
    %66 = arith.addf %64, %65 : vector<8x128xf32>
    %67 = math.tanh %66 : vector<8x128xf32>
    %68 = arith.mulf %62, %67 : vector<8x128xf32>
    %c0_28 = arith.constant 0 : index
    %c0_29 = arith.constant 0 : index
    %69 = vector.load %arg7[%c0_28, %c0_29] : memref<8x128xf32, #tpu.memory_space<vmem>>, vector<8x128xf32>
    tpu.vector_store %arg7[%c0_28, %c0_29], %68 {strides = array<i32>} : memref<8x128xf32, #tpu.memory_space<vmem>>, vector<8x128xf32>,
    %c0_30 = arith.constant 0 : index
    %c0_31 = arith.constant 0 : index
    %70 = vector.load %arg8[%c0_30, %c0_31] : memref<8x128xf32, #tpu.memory_space<vmem>>, vector<8x128xf32>
    tpu.vector_store %arg8[%c0_30, %c0_31], %66 {strides = array<i32>} : memref<8x128xf32, #tpu.memory_space<vmem>>, vector<8x128xf32>,
    %c2_i32 = arith.constant 2 : i32
    %71 = arith.index_cast %c2_i32 : i32 to index
    %c0_32 = arith.constant 0 : index
    %c0_33 = arith.constant 0 : index
    %72 = vector.load %arg2[%71, %c0_32, %c0_33] : memref<8x8x512xf32, #tpu.memory_space<vmem>>, vector<1x8x512xf32>
    %73 = vector.shape_cast %72 : vector<1x8x512xf32> to vector<8x512xf32>
    %c0_34 = arith.constant 0 : index
    %c0_35 = arith.constant 0 : index
    %74 = vector.load %arg7[%c0_34, %c0_35] : memref<8x128xf32, #tpu.memory_space<vmem>>, vector<8x128xf32>
    %c0_36 = arith.constant 0 : index
    %c0_37 = arith.constant 0 : index
    %75 = vector.load %arg3[%c0_36, %c0_37] : memref<128x512xf32, #tpu.memory_space<vmem>>, vector<128x512xf32>
    %cst_38 = arith.constant dense<0.000000e+00> : vector<8x512xf32>
    %76 = tpu.matmul %74, %75, %cst_38 {dimension_numbers = #tpu.dot_dimension_numbers<[1], [0], [0], [1], [0, 0, 1, 1], [], []>} : vector<8x128xf32>, vector<128x512xf32>, vector<8x512xf32> -> vector<8x512xf32>
    %77 = arith.addf %73, %76 : vector<8x512xf32>
    %78 = arith.negf %77 : vector<8x512xf32>
    %79 = math.exp %78 : vector<8x512xf32>
    %cst_39 = arith.constant 1.000000e+00 : f32
    %80 = vector.broadcast %cst_39 : f32 to vector<8x512xf32>
    %81 = arith.addf %80, %79 : vector<8x512xf32>
    %82 = arith.divf %80, %81 : vector<8x512xf32>
    %83 = vector.broadcast %11 : vector<1x512xf32> to vector<8x512xf32>
    %84 = arith.mulf %82, %83 : vector<8x512xf32>
    %85 = vector.broadcast %14 : vector<1x512xf32> to vector<8x512xf32>
    %86 = arith.addf %84, %85 : vector<8x512xf32>
    %87 = vector.extract_strided_slice %86 {offsets = [0, 0], sizes = [8, 128], strides = [1, 1]} : vector<8x512xf32> to vector<8x128xf32>
    %88 = vector.extract_strided_slice %86 {offsets = [0, 128], sizes = [8, 128], strides = [1, 1]} : vector<8x512xf32> to vector<8x128xf32>
    %89 = vector.extract_strided_slice %86 {offsets = [0, 256], sizes = [8, 128], strides = [1, 1]} : vector<8x512xf32> to vector<8x128xf32>
    %90 = vector.extract_strided_slice %86 {offsets = [0, 384], sizes = [8, 128], strides = [1, 1]} : vector<8x512xf32> to vector<8x128xf32>
    %c0_40 = arith.constant 0 : index
    %c0_41 = arith.constant 0 : index
    %91 = vector.load %arg8[%c0_40, %c0_41] : memref<8x128xf32, #tpu.memory_space<vmem>>, vector<8x128xf32>
    %92 = arith.mulf %88, %91 : vector<8x128xf32>
    %93 = arith.mulf %87, %89 : vector<8x128xf32>
    %94 = arith.addf %92, %93 : vector<8x128xf32>
    %95 = math.tanh %94 : vector<8x128xf32>
    %96 = arith.mulf %90, %95 : vector<8x128xf32>
    %c0_42 = arith.constant 0 : index
    %c0_43 = arith.constant 0 : index
    %97 = vector.load %arg7[%c0_42, %c0_43] : memref<8x128xf32, #tpu.memory_space<vmem>>, vector<8x128xf32>
    tpu.vector_store %arg7[%c0_42, %c0_43], %96 {strides = array<i32>} : memref<8x128xf32, #tpu.memory_space<vmem>>, vector<8x128xf32>,
    %c0_44 = arith.constant 0 : index
    %c0_45 = arith.constant 0 : index
    %98 = vector.load %arg8[%c0_44, %c0_45] : memref<8x128xf32, #tpu.memory_space<vmem>>, vector<8x128xf32>
    tpu.vector_store %arg8[%c0_44, %c0_45], %94 {strides = array<i32>} : memref<8x128xf32, #tpu.memory_space<vmem>>, vector<8x128xf32>,
    %c3_i32 = arith.constant 3 : i32
    %99 = arith.index_cast %c3_i32 : i32 to index
    %c0_46 = arith.constant 0 : index
    %c0_47 = arith.constant 0 : index
    %100 = vector.load %arg2[%99, %c0_46, %c0_47] : memref<8x8x512xf32, #tpu.memory_space<vmem>>, vector<1x8x512xf32>
    %101 = vector.shape_cast %100 : vector<1x8x512xf32> to vector<8x512xf32>
    %c0_48 = arith.constant 0 : index
    %c0_49 = arith.constant 0 : index
    %102 = vector.load %arg7[%c0_48, %c0_49] : memref<8x128xf32, #tpu.memory_space<vmem>>, vector<8x128xf32>
    %c0_50 = arith.constant 0 : index
    %c0_51 = arith.constant 0 : index
    %103 = vector.load %arg3[%c0_50, %c0_51] : memref<128x512xf32, #tpu.memory_space<vmem>>, vector<128x512xf32>
    %cst_52 = arith.constant dense<0.000000e+00> : vector<8x512xf32>
    %104 = tpu.matmul %102, %103, %cst_52 {dimension_numbers = #tpu.dot_dimension_numbers<[1], [0], [0], [1], [0, 0, 1, 1], [], []>} : vector<8x128xf32>, vector<128x512xf32>, vector<8x512xf32> -> vector<8x512xf32>
    %105 = arith.addf %101, %104 : vector<8x512xf32>
    %106 = arith.negf %105 : vector<8x512xf32>
    %107 = math.exp %106 : vector<8x512xf32>
    %cst_53 = arith.constant 1.000000e+00 : f32
    %108 = vector.broadcast %cst_53 : f32 to vector<8x512xf32>
    %109 = arith.addf %108, %107 : vector<8x512xf32>
    %110 = arith.divf %108, %109 : vector<8x512xf32>
    %111 = vector.broadcast %11 : vector<1x512xf32> to vector<8x512xf32>
    %112 = arith.mulf %110, %111 : vector<8x512xf32>
    %113 = vector.broadcast %14 : vector<1x512xf32> to vector<8x512xf32>
    %114 = arith.addf %112, %113 : vector<8x512xf32>
    %115 = vector.extract_strided_slice %114 {offsets = [0, 0], sizes = [8, 128], strides = [1, 1]} : vector<8x512xf32> to vector<8x128xf32>
    %116 = vector.extract_strided_slice %114 {offsets = [0, 128], sizes = [8, 128], strides = [1, 1]} : vector<8x512xf32> to vector<8x128xf32>
    %117 = vector.extract_strided_slice %114 {offsets = [0, 256], sizes = [8, 128], strides = [1, 1]} : vector<8x512xf32> to vector<8x128xf32>
    %118 = vector.extract_strided_slice %114 {offsets = [0, 384], sizes = [8, 128], strides = [1, 1]} : vector<8x512xf32> to vector<8x128xf32>
    %c0_54 = arith.constant 0 : index
    %c0_55 = arith.constant 0 : index
    %119 = vector.load %arg8[%c0_54, %c0_55] : memref<8x128xf32, #tpu.memory_space<vmem>>, vector<8x128xf32>
    %120 = arith.mulf %116, %119 : vector<8x128xf32>
    %121 = arith.mulf %115, %117 : vector<8x128xf32>
    %122 = arith.addf %120, %121 : vector<8x128xf32>
    %123 = math.tanh %122 : vector<8x128xf32>
    %124 = arith.mulf %118, %123 : vector<8x128xf32>
    %c0_56 = arith.constant 0 : index
    %c0_57 = arith.constant 0 : index
    %125 = vector.load %arg7[%c0_56, %c0_57] : memref<8x128xf32, #tpu.memory_space<vmem>>, vector<8x128xf32>
    tpu.vector_store %arg7[%c0_56, %c0_57], %124 {strides = array<i32>} : memref<8x128xf32, #tpu.memory_space<vmem>>, vector<8x128xf32>,
    %c0_58 = arith.constant 0 : index
    %c0_59 = arith.constant 0 : index
    %126 = vector.load %arg8[%c0_58, %c0_59] : memref<8x128xf32, #tpu.memory_space<vmem>>, vector<8x128xf32>
    tpu.vector_store %arg8[%c0_58, %c0_59], %122 {strides = array<i32>} : memref<8x128xf32, #tpu.memory_space<vmem>>, vector<8x128xf32>,
    %c4_i32 = arith.constant 4 : i32
    %127 = arith.index_cast %c4_i32 : i32 to index
    %c0_60 = arith.constant 0 : index
    %c0_61 = arith.constant 0 : index
    %128 = vector.load %arg2[%127, %c0_60, %c0_61] : memref<8x8x512xf32, #tpu.memory_space<vmem>>, vector<1x8x512xf32>
    %129 = vector.shape_cast %128 : vector<1x8x512xf32> to vector<8x512xf32>
    %c0_62 = arith.constant 0 : index
    %c0_63 = arith.constant 0 : index
    %130 = vector.load %arg7[%c0_62, %c0_63] : memref<8x128xf32, #tpu.memory_space<vmem>>, vector<8x128xf32>
    %c0_64 = arith.constant 0 : index
    %c0_65 = arith.constant 0 : index
    %131 = vector.load %arg3[%c0_64, %c0_65] : memref<128x512xf32, #tpu.memory_space<vmem>>, vector<128x512xf32>
    %cst_66 = arith.constant dense<0.000000e+00> : vector<8x512xf32>
    %132 = tpu.matmul %130, %131, %cst_66 {dimension_numbers = #tpu.dot_dimension_numbers<[1], [0], [0], [1], [0, 0, 1, 1], [], []>} : vector<8x128xf32>, vector<128x512xf32>, vector<8x512xf32> -> vector<8x512xf32>
    %133 = arith.addf %129, %132 : vector<8x512xf32>
    %134 = arith.negf %133 : vector<8x512xf32>
    %135 = math.exp %134 : vector<8x512xf32>
    %cst_67 = arith.constant 1.000000e+00 : f32
    %136 = vector.broadcast %cst_67 : f32 to vector<8x512xf32>
    %137 = arith.addf %136, %135 : vector<8x512xf32>
    %138 = arith.divf %136, %137 : vector<8x512xf32>
    %139 = vector.broadcast %11 : vector<1x512xf32> to vector<8x512xf32>
    %140 = arith.mulf %138, %139 : vector<8x512xf32>
    %141 = vector.broadcast %14 : vector<1x512xf32> to vector<8x512xf32>
    %142 = arith.addf %140, %141 : vector<8x512xf32>
    %143 = vector.extract_strided_slice %142 {offsets = [0, 0], sizes = [8, 128], strides = [1, 1]} : vector<8x512xf32> to vector<8x128xf32>
    %144 = vector.extract_strided_slice %142 {offsets = [0, 128], sizes = [8, 128], strides = [1, 1]} : vector<8x512xf32> to vector<8x128xf32>
    %145 = vector.extract_strided_slice %142 {offsets = [0, 256], sizes = [8, 128], strides = [1, 1]} : vector<8x512xf32> to vector<8x128xf32>
    %146 = vector.extract_strided_slice %142 {offsets = [0, 384], sizes = [8, 128], strides = [1, 1]} : vector<8x512xf32> to vector<8x128xf32>
    %c0_68 = arith.constant 0 : index
    %c0_69 = arith.constant 0 : index
    %147 = vector.load %arg8[%c0_68, %c0_69] : memref<8x128xf32, #tpu.memory_space<vmem>>, vector<8x128xf32>
    %148 = arith.mulf %144, %147 : vector<8x128xf32>
    %149 = arith.mulf %143, %145 : vector<8x128xf32>
    %150 = arith.addf %148, %149 : vector<8x128xf32>
    %151 = math.tanh %150 : vector<8x128xf32>
    %152 = arith.mulf %146, %151 : vector<8x128xf32>
    %c0_70 = arith.constant 0 : index
    %c0_71 = arith.constant 0 : index
    %153 = vector.load %arg7[%c0_70, %c0_71] : memref<8x128xf32, #tpu.memory_space<vmem>>, vector<8x128xf32>
    tpu.vector_store %arg7[%c0_70, %c0_71], %152 {strides = array<i32>} : memref<8x128xf32, #tpu.memory_space<vmem>>, vector<8x128xf32>,
    %c0_72 = arith.constant 0 : index
    %c0_73 = arith.constant 0 : index
    %154 = vector.load %arg8[%c0_72, %c0_73] : memref<8x128xf32, #tpu.memory_space<vmem>>, vector<8x128xf32>
    tpu.vector_store %arg8[%c0_72, %c0_73], %150 {strides = array<i32>} : memref<8x128xf32, #tpu.memory_space<vmem>>, vector<8x128xf32>,
    %c5_i32 = arith.constant 5 : i32
    %155 = arith.index_cast %c5_i32 : i32 to index
    %c0_74 = arith.constant 0 : index
    %c0_75 = arith.constant 0 : index
    %156 = vector.load %arg2[%155, %c0_74, %c0_75] : memref<8x8x512xf32, #tpu.memory_space<vmem>>, vector<1x8x512xf32>
    %157 = vector.shape_cast %156 : vector<1x8x512xf32> to vector<8x512xf32>
    %c0_76 = arith.constant 0 : index
    %c0_77 = arith.constant 0 : index
    %158 = vector.load %arg7[%c0_76, %c0_77] : memref<8x128xf32, #tpu.memory_space<vmem>>, vector<8x128xf32>
    %c0_78 = arith.constant 0 : index
    %c0_79 = arith.constant 0 : index
    %159 = vector.load %arg3[%c0_78, %c0_79] : memref<128x512xf32, #tpu.memory_space<vmem>>, vector<128x512xf32>
    %cst_80 = arith.constant dense<0.000000e+00> : vector<8x512xf32>
    %160 = tpu.matmul %158, %159, %cst_80 {dimension_numbers = #tpu.dot_dimension_numbers<[1], [0], [0], [1], [0, 0, 1, 1], [], []>} : vector<8x128xf32>, vector<128x512xf32>, vector<8x512xf32> -> vector<8x512xf32>
    %161 = arith.addf %157, %160 : vector<8x512xf32>
    %162 = arith.negf %161 : vector<8x512xf32>
    %163 = math.exp %162 : vector<8x512xf32>
    %cst_81 = arith.constant 1.000000e+00 : f32
    %164 = vector.broadcast %cst_81 : f32 to vector<8x512xf32>
    %165 = arith.addf %164, %163 : vector<8x512xf32>
    %166 = arith.divf %164, %165 : vector<8x512xf32>
    %167 = vector.broadcast %11 : vector<1x512xf32> to vector<8x512xf32>
    %168 = arith.mulf %166, %167 : vector<8x512xf32>
    %169 = vector.broadcast %14 : vector<1x512xf32> to vector<8x512xf32>
    %170 = arith.addf %168, %169 : vector<8x512xf32>
    %171 = vector.extract_strided_slice %170 {offsets = [0, 0], sizes = [8, 128], strides = [1, 1]} : vector<8x512xf32> to vector<8x128xf32>
    %172 = vector.extract_strided_slice %170 {offsets = [0, 128], sizes = [8, 128], strides = [1, 1]} : vector<8x512xf32> to vector<8x128xf32>
    %173 = vector.extract_strided_slice %170 {offsets = [0, 256], sizes = [8, 128], strides = [1, 1]} : vector<8x512xf32> to vector<8x128xf32>
    %174 = vector.extract_strided_slice %170 {offsets = [0, 384], sizes = [8, 128], strides = [1, 1]} : vector<8x512xf32> to vector<8x128xf32>
    %c0_82 = arith.constant 0 : index
    %c0_83 = arith.constant 0 : index
    %175 = vector.load %arg8[%c0_82, %c0_83] : memref<8x128xf32, #tpu.memory_space<vmem>>, vector<8x128xf32>
    %176 = arith.mulf %172, %175 : vector<8x128xf32>
    %177 = arith.mulf %171, %173 : vector<8x128xf32>
    %178 = arith.addf %176, %177 : vector<8x128xf32>
    %179 = math.tanh %178 : vector<8x128xf32>
    %180 = arith.mulf %174, %179 : vector<8x128xf32>
    %c0_84 = arith.constant 0 : index
    %c0_85 = arith.constant 0 : index
    %181 = vector.load %arg7[%c0_84, %c0_85] : memref<8x128xf32, #tpu.memory_space<vmem>>, vector<8x128xf32>
    tpu.vector_store %arg7[%c0_84, %c0_85], %180 {strides = array<i32>} : memref<8x128xf32, #tpu.memory_space<vmem>>, vector<8x128xf32>,
    %c0_86 = arith.constant 0 : index
    %c0_87 = arith.constant 0 : index
    %182 = vector.load %arg8[%c0_86, %c0_87] : memref<8x128xf32, #tpu.memory_space<vmem>>, vector<8x128xf32>
    tpu.vector_store %arg8[%c0_86, %c0_87], %178 {strides = array<i32>} : memref<8x128xf32, #tpu.memory_space<vmem>>, vector<8x128xf32>,
    %c6_i32 = arith.constant 6 : i32
    %183 = arith.index_cast %c6_i32 : i32 to index
    %c0_88 = arith.constant 0 : index
    %c0_89 = arith.constant 0 : index
    %184 = vector.load %arg2[%183, %c0_88, %c0_89] : memref<8x8x512xf32, #tpu.memory_space<vmem>>, vector<1x8x512xf32>
    %185 = vector.shape_cast %184 : vector<1x8x512xf32> to vector<8x512xf32>
    %c0_90 = arith.constant 0 : index
    %c0_91 = arith.constant 0 : index
    %186 = vector.load %arg7[%c0_90, %c0_91] : memref<8x128xf32, #tpu.memory_space<vmem>>, vector<8x128xf32>
    %c0_92 = arith.constant 0 : index
    %c0_93 = arith.constant 0 : index
    %187 = vector.load %arg3[%c0_92, %c0_93] : memref<128x512xf32, #tpu.memory_space<vmem>>, vector<128x512xf32>
    %cst_94 = arith.constant dense<0.000000e+00> : vector<8x512xf32>
    %188 = tpu.matmul %186, %187, %cst_94 {dimension_numbers = #tpu.dot_dimension_numbers<[1], [0], [0], [1], [0, 0, 1, 1], [], []>} : vector<8x128xf32>, vector<128x512xf32>, vector<8x512xf32> -> vector<8x512xf32>
    %189 = arith.addf %185, %188 : vector<8x512xf32>
    %190 = arith.negf %189 : vector<8x512xf32>
    %191 = math.exp %190 : vector<8x512xf32>
    %cst_95 = arith.constant 1.000000e+00 : f32
    %192 = vector.broadcast %cst_95 : f32 to vector<8x512xf32>
    %193 = arith.addf %192, %191 : vector<8x512xf32>
    %194 = arith.divf %192, %193 : vector<8x512xf32>
    %195 = vector.broadcast %11 : vector<1x512xf32> to vector<8x512xf32>
    %196 = arith.mulf %194, %195 : vector<8x512xf32>
    %197 = vector.broadcast %14 : vector<1x512xf32> to vector<8x512xf32>
    %198 = arith.addf %196, %197 : vector<8x512xf32>
    %199 = vector.extract_strided_slice %198 {offsets = [0, 0], sizes = [8, 128], strides = [1, 1]} : vector<8x512xf32> to vector<8x128xf32>
    %200 = vector.extract_strided_slice %198 {offsets = [0, 128], sizes = [8, 128], strides = [1, 1]} : vector<8x512xf32> to vector<8x128xf32>
    %201 = vector.extract_strided_slice %198 {offsets = [0, 256], sizes = [8, 128], strides = [1, 1]} : vector<8x512xf32> to vector<8x128xf32>
    %202 = vector.extract_strided_slice %198 {offsets = [0, 384], sizes = [8, 128], strides = [1, 1]} : vector<8x512xf32> to vector<8x128xf32>
    %c0_96 = arith.constant 0 : index
    %c0_97 = arith.constant 0 : index
    %203 = vector.load %arg8[%c0_96, %c0_97] : memref<8x128xf32, #tpu.memory_space<vmem>>, vector<8x128xf32>
    %204 = arith.mulf %200, %203 : vector<8x128xf32>
    %205 = arith.mulf %199, %201 : vector<8x128xf32>
    %206 = arith.addf %204, %205 : vector<8x128xf32>
    %207 = math.tanh %206 : vector<8x128xf32>
    %208 = arith.mulf %202, %207 : vector<8x128xf32>
    %c0_98 = arith.constant 0 : index
    %c0_99 = arith.constant 0 : index
    %209 = vector.load %arg7[%c0_98, %c0_99] : memref<8x128xf32, #tpu.memory_space<vmem>>, vector<8x128xf32>
    tpu.vector_store %arg7[%c0_98, %c0_99], %208 {strides = array<i32>} : memref<8x128xf32, #tpu.memory_space<vmem>>, vector<8x128xf32>,
    %c0_100 = arith.constant 0 : index
    %c0_101 = arith.constant 0 : index
    %210 = vector.load %arg8[%c0_100, %c0_101] : memref<8x128xf32, #tpu.memory_space<vmem>>, vector<8x128xf32>
    tpu.vector_store %arg8[%c0_100, %c0_101], %206 {strides = array<i32>} : memref<8x128xf32, #tpu.memory_space<vmem>>, vector<8x128xf32>,
    %c7_i32 = arith.constant 7 : i32
    %211 = arith.index_cast %c7_i32 : i32 to index
    %c0_102 = arith.constant 0 : index
    %c0_103 = arith.constant 0 : index
    %212 = vector.load %arg2[%211, %c0_102, %c0_103] : memref<8x8x512xf32, #tpu.memory_space<vmem>>, vector<1x8x512xf32>
    %213 = vector.shape_cast %212 : vector<1x8x512xf32> to vector<8x512xf32>
    %c0_104 = arith.constant 0 : index
    %c0_105 = arith.constant 0 : index
    %214 = vector.load %arg7[%c0_104, %c0_105] : memref<8x128xf32, #tpu.memory_space<vmem>>, vector<8x128xf32>
    %c0_106 = arith.constant 0 : index
    %c0_107 = arith.constant 0 : index
    %215 = vector.load %arg3[%c0_106, %c0_107] : memref<128x512xf32, #tpu.memory_space<vmem>>, vector<128x512xf32>
    %cst_108 = arith.constant dense<0.000000e+00> : vector<8x512xf32>
    %216 = tpu.matmul %214, %215, %cst_108 {dimension_numbers = #tpu.dot_dimension_numbers<[1], [0], [0], [1], [0, 0, 1, 1], [], []>} : vector<8x128xf32>, vector<128x512xf32>, vector<8x512xf32> -> vector<8x512xf32>
    %217 = arith.addf %213, %216 : vector<8x512xf32>
    %218 = arith.negf %217 : vector<8x512xf32>
    %219 = math.exp %218 : vector<8x512xf32>
    %cst_109 = arith.constant 1.000000e+00 : f32
    %220 = vector.broadcast %cst_109 : f32 to vector<8x512xf32>
    %221 = arith.addf %220, %219 : vector<8x512xf32>
    %222 = arith.divf %220, %221 : vector<8x512xf32>
    %223 = vector.broadcast %11 : vector<1x512xf32> to vector<8x512xf32>
    %224 = arith.mulf %222, %223 : vector<8x512xf32>
    %225 = vector.broadcast %14 : vector<1x512xf32> to vector<8x512xf32>
    %226 = arith.addf %224, %225 : vector<8x512xf32>
    %227 = vector.extract_strided_slice %226 {offsets = [0, 0], sizes = [8, 128], strides = [1, 1]} : vector<8x512xf32> to vector<8x128xf32>
    %228 = vector.extract_strided_slice %226 {offsets = [0, 128], sizes = [8, 128], strides = [1, 1]} : vector<8x512xf32> to vector<8x128xf32>
    %229 = vector.extract_strided_slice %226 {offsets = [0, 256], sizes = [8, 128], strides = [1, 1]} : vector<8x512xf32> to vector<8x128xf32>
    %230 = vector.extract_strided_slice %226 {offsets = [0, 384], sizes = [8, 128], strides = [1, 1]} : vector<8x512xf32> to vector<8x128xf32>
    %c0_110 = arith.constant 0 : index
    %c0_111 = arith.constant 0 : index
    %231 = vector.load %arg8[%c0_110, %c0_111] : memref<8x128xf32, #tpu.memory_space<vmem>>, vector<8x128xf32>
    %232 = arith.mulf %228, %231 : vector<8x128xf32>
    %233 = arith.mulf %227, %229 : vector<8x128xf32>
    %234 = arith.addf %232, %233 : vector<8x128xf32>
    %235 = math.tanh %234 : vector<8x128xf32>
    %236 = arith.mulf %230, %235 : vector<8x128xf32>
    %c0_112 = arith.constant 0 : index
    %c0_113 = arith.constant 0 : index
    %237 = vector.load %arg7[%c0_112, %c0_113] : memref<8x128xf32, #tpu.memory_space<vmem>>, vector<8x128xf32>
    tpu.vector_store %arg7[%c0_112, %c0_113], %236 {strides = array<i32>} : memref<8x128xf32, #tpu.memory_space<vmem>>, vector<8x128xf32>,
    %c0_114 = arith.constant 0 : index
    %c0_115 = arith.constant 0 : index
    %238 = vector.load %arg8[%c0_114, %c0_115] : memref<8x128xf32, #tpu.memory_space<vmem>>, vector<8x128xf32>
    tpu.vector_store %arg8[%c0_114, %c0_115], %234 {strides = array<i32>} : memref<8x128xf32, #tpu.memory_space<vmem>>, vector<8x128xf32>,
    %c8_i32 = arith.constant 8 : i32
    %c0_i32_116 = arith.constant 0 : i32
    %239 = arith.cmpi eq, %arg1, %c0_i32_116 : i32
    %240 = arith.extui %239 : i1 to i32
    %c0_i32_117 = arith.constant 0 : i32
    %241 = arith.cmpi ne, %240, %c0_i32_117 : i32
    scf.if %241 {
      %c0_118 = arith.constant 0 : index
      %c0_119 = arith.constant 0 : index
      %242 = vector.load %arg7[%c0_118, %c0_119] : memref<8x128xf32, #tpu.memory_space<vmem>>, vector<8x128xf32>
      %c0_120 = arith.constant 0 : index
      %c0_121 = arith.constant 0 : index
      %243 = vector.load %arg4[%c0_120, %c0_121] : memref<128x8xf32, #tpu.memory_space<vmem>>, vector<128x8xf32>
      %cst_122 = arith.constant dense<0.000000e+00> : vector<8x8xf32>
      %244 = tpu.matmul %242, %243, %cst_122 {dimension_numbers = #tpu.dot_dimension_numbers<[1], [0], [0], [1], [0, 0, 1, 1], [], []>} : vector<8x128xf32>, vector<128x8xf32>, vector<8x8xf32> -> vector<8x8xf32>
      %c0_123 = arith.constant 0 : index
      %c0_124 = arith.constant 0 : index
      %245 = vector.load %arg5[%c0_123, %c0_124] : memref<1x8xf32, #tpu.memory_space<vmem>>, vector<1x8xf32>
      %246 = vector.broadcast %245 : vector<1x8xf32> to vector<8x8xf32>
      %247 = arith.addf %244, %246 : vector<8x8xf32>
      %c0_125 = arith.constant 0 : index
      %c0_126 = arith.constant 0 : index
      %248 = vector.load %arg6[%c0_125, %c0_126] : memref<8x8xf32, #tpu.memory_space<vmem>>, vector<8x8xf32>
      tpu.vector_store %arg6[%c0_125, %c0_126], %247 {strides = array<i32>} : memref<8x8xf32, #tpu.memory_space<vmem>>, vector<8x8xf32>,
    } else {
    }
    return
  }
  func.func @transform_0(%arg0: i32, %arg1: i32) -> (i32, i32, i32) {
    %c0_i32 = arith.constant 0 : i32
    %c0_i32_0 = arith.constant 0 : i32
    return %arg1, %arg0, %c0_i32 : i32, i32, i32
  }
  func.func @transform_1(%arg0: i32, %arg1: i32) -> (i32, i32) {
    %c0_i32 = arith.constant 0 : i32
    %c0_i32_0 = arith.constant 0 : i32
    %c0_i32_1 = arith.constant 0 : i32
    return %c0_i32, %c0_i32_0 : i32, i32
  }
  func.func @transform_2(%arg0: i32, %arg1: i32) -> (i32, i32) {
    %c0_i32 = arith.constant 0 : i32
    %c0_i32_0 = arith.constant 0 : i32
    %c0_i32_1 = arith.constant 0 : i32
    return %c0_i32, %c0_i32_0 : i32, i32
  }
  func.func @transform_3(%arg0: i32, %arg1: i32) -> (i32, i32) {
    %c0_i32 = arith.constant 0 : i32
    %c0_i32_0 = arith.constant 0 : i32
    %c0_i32_1 = arith.constant 0 : i32
    return %c0_i32, %c0_i32_0 : i32, i32
  }
  func.func @transform_4(%arg0: i32, %arg1: i32) -> (i32, i32) {
    %c0_i32 = arith.constant 0 : i32
    %c0_i32_0 = arith.constant 0 : i32
    return %arg0, %c0_i32 : i32, i32
  }
}

</mosaic_0001>

<bundles_post_ra>
// kernel: tpu_custom_call.1
= control target key start
LH: loop header
LB: loop body
LE: loop exit
PB: predicated region body
PF: predicated region fallthrough
CT: control target
= control target key end

     0   :  { %9 = vsyncpa [#allocation5], 0  ;;  %s3635_s0 = inlined_call_operand.hbm [shape: f32[8,8,512], index: 0, kind: input, shape index: {}]   ;;  %s3636_s1 = inlined_call_operand.hbm [shape: f32[128,512], index: 1, kind: input, shape index: {}]   ;;  %s3637_s2 = inlined_call_operand.vmem [shape: f32[128,8], index: 2, kind: input, shape index: {}]   ;;  %s3638_s3 = inlined_call_operand.vmem [shape: f32[1,8], index: 3, kind: input, shape index: {}]   ;;  %s3639_s4 = inlined_call_operand.hbm [shape: f32[8,8], index: 4, kind: output, shape index: {}]  }
   0x1   :  { %10 = vsyncpa [#allocation8], 0 }
   0x2   :  { %11 = vsyncpa [#allocation6], 0  ;;  %s3084_s15 = smov [#allocation4]   ;;  %s3012_s19 = scalar_lea.hbm %s3635_s0, 4096 }
   0x3   :  { %s17_s16 = sshll.u32 %s3084_s15, 4  ;;  %p3013_p0 = scmp.ne.s32.totalorder %s3635_s0, %s3012_s19  ;;  %s18_s16 = int_to_ptr.vmem [resolvable:$true] %s17_s16 }
   0x4   :  { %p3016_p1 = scmp.lt.u32.totalorder %s3012_s19, %s3635_s0 }
   0x6   :  { %p3018_p2 = pnand %p3016_p1, %p3013_p0 }
   0x8   :  { %3021 = shalt.err (!%p3018_p2)
}
   0x9   :  { %s3022_s24 = scalar_lea.vmem %s18_s16, 4096  ;;  %p3027_p4 = scmp.lt.s32.totalorder %s18_s16, %s18_s16 }
   0xa   :  { %p3023_p3 = scmp.ne.s32.totalorder %s18_s16, %s3022_s24  ;;  %p3028_p5 = scmp.lt.s32.totalorder %s3022_s24, %s3022_s24 }
   0xc   :  { %p3029_p6 = por %p3028_p5, %p3027_p4 }
   0xe   :  { %p3030_p7 = pnand %p3029_p6, %p3023_p3 }
  0x10   :  { %3033 = shalt.err (!%p3030_p7)
}
  0x11   :  { %s3085_s25 = smov 512   ;;  %s3086_s26 = smov 32  }
  0x12   :  { %23 = dma.hbm_to_vmem [thread:$0]  %s3635_s0, 4096, %s18_s16, [#allocation5], %s3085_s25, %s3085_s25, %s3086_s26  }
  0x13   :  { %s3087_s29 = smov [#allocation7]   ;;  %s3034_s7 = scalar_lea.hbm %s3636_s1, 8192 }
  0x14   :  { %s29_s30 = sshll.u32 %s3087_s29, 4  ;;  %p3035_p8 = scmp.ne.s32.totalorder %s3636_s1, %s3034_s7  ;;  %s30_s30 = int_to_ptr.vmem [resolvable:$true] %s29_s30 }
  0x15   :  { %p3038_p9 = scmp.lt.u32.totalorder %s3034_s7, %s3636_s1 }
  0x17   :  { %p3040_p10 = pnand %p3038_p9, %p3035_p8 }
  0x19   :  { %3043 = shalt.err (!%p3040_p10)
}
  0x1a   :  { %s3044_s12 = scalar_lea.vmem %s30_s30, 8192  ;;  %p3049_p12 = scmp.lt.s32.totalorder %s30_s30, %s30_s30 }
  0x1b   :  { %p3045_p11 = scmp.ne.s32.totalorder %s30_s30, %s3044_s12  ;;  %p3050_p13 = scmp.lt.s32.totalorder %s3044_s12, %s3044_s12 }
  0x1d   :  { %p3051_p0 = por %p3050_p13, %p3049_p12 }
  0x1f   :  { %p3052_p1 = pnand %p3051_p0, %p3045_p11 }
  0x21   :  { %3055 = shalt.err (!%p3052_p1)
}
  0x22   :  { %35 = dma.hbm_to_vmem [thread:$0]  %s3636_s1, 8192, %s30_s30, [#allocation8], %s3085_s25, %s3085_s25, %s3086_s26  }
  0x23   :  { %3078 = dma.done.wait [#allocation5], 4096  }
  0x24   :  { %3079 = vsyncadd [#allocation5], 4294963200 }
  0x25   :  { %3080 = dma.done.wait [#allocation8], 8192  }
  0x26   :  { %3081 = vsyncadd [#allocation8], 4294959104  ;;  %v3088_v0 = vmov 0.0   ;;  %v85_v1 = vld [vmem:[#allocation7 + $0x18] sm:$0xff]  ;;  %v84_v3 = vld [vmem:[#allocation7 + $0x10] sm:$0xff]  ;;  %vm3090_vm0 = vmmov 0  }
  0x27   :  { %281 = vmatprep.mubr.f32.mxu1 %v3088_v0  ;;  %210 = vmatprep.mubr.f32.mxu0 %v3088_v0  ;;  %v89_v2 = vld [vmem:[#allocation7 + $0x38] sm:$0xff]  ;;  %v88_v5 = vld [vmem:[#allocation7 + $0x30] sm:$0xff]  ;;  %v83_v6 = vld [vmem:[#allocation7 + $0x8] sm:$0xff]  ;;  %s3091_s18 = smov [#allocation9]   ;;  %vm2221_vm1 = vcmask 64512  }
  0x28   :  { %v3143_v4 = vpack.c.bf16 %v89_v2, %v85_v1  ;;  %v87_v7 = vld [vmem:[#allocation7 + $0x28] sm:$0xff]  ;;  %v3145_v8 = vpack.c.bf16 %v88_v5, %v84_v3  ;;  %v82_v10 = vld [vmem:[#allocation7] sm:$0xff]  ;;  %v93_v12 = vld [vmem:[#allocation7 + $0x58] sm:$0xff]  ;;  %s2229_s19 = sshll.u32 %s3091_s18, 4  ;;  %s2230_s19 = int_to_ptr.vmem [resolvable:$true] %s2229_s19 }
  0x29   :  { %v3147_v9 = vpack.c.bf16 %v87_v7, %v83_v6  ;;  %v86_v11 = vld [vmem:[#allocation7 + $0x20] sm:$0xff]  ;;  %v97_v14 = vld [vmem:[#allocation7 + $0x78] sm:$0xff]  ;;  %v92_v15 = vld [vmem:[#allocation7 + $0x50] sm:$0xff]  ;;  %s3056_s20 = scalar_lea.vmem %s2230_s19, 128  ;;  %p3061_p3 = scmp.lt.s32.totalorder %s2230_s19, %s2230_s19 }
  0x2a   :  { %2357 = vmatprep.subr.bf16.mxu1 %v3143_v4  ;;  %v3150_v13 = vpack.c.bf16 %v86_v11, %v82_v10  ;;  %v96_v16 = vld [vmem:[#allocation7 + $0x70] sm:$0xff]  ;;  %v3154_v17 = vpack.c.bf16 %v97_v14, %v93_v12  ;;  %v91_v19 = vld [vmem:[#allocation7 + $0x48] sm:$0xff]  ;;  %v90_v21 = vld [vmem:[#allocation7 + $0x40] sm:$0xff]  ;;  %p3057_p2 = scmp.ne.s32.totalorder %s2230_s19, %s3056_s20  ;;  %p3062_p4 = scmp.lt.s32.totalorder %s3056_s20, %s3056_s20 }
  0x2b   :  { %2359 = vmatpush1.bf16.msra.mxu1 %v3145_v8  ;;  %2325 = vmatprep.subr.bf16.mxu0 %v3147_v9  ;;  %v3156_v18 = vpack.c.bf16 %v96_v16, %v92_v15  ;;  %v95_v20 = vld [vmem:[#allocation7 + $0x68] sm:$0xff]  ;;  %v94_v23 = vld [vmem:[#allocation7 + $0x60] sm:$0xff]  ;;  %v101_v24 = vld [vmem:[#allocation7 + $0x98] sm:$0xff] }
  0x2c   :  { %2327 = vmatpush1.bf16.msra.mxu0 %v3150_v13  ;;  %v3159_v22 = vpack.c.bf16 %v95_v20, %v91_v19  ;;  %v105_v25 = vld [vmem:[#allocation7 + $0xb8] sm:$0xff]  ;;  %2361 = vmatprep.subr.bf16.mxu1 %v3154_v17  ;;  %v3162_v26 = vpack.c.bf16 %v94_v23, %v90_v21  ;;  %v100_v28 = vld [vmem:[#allocation7 + $0x90] sm:$0xff]  ;;  %v99_v30 = vld [vmem:[#allocation7 + $0x88] sm:$0xff]  ;;  %p3063_p5 = por %p3062_p4, %p3061_p3 }
  0x2d   :  { %v3164_v27 = vpack.c.bf16 %v105_v25, %v101_v24  ;;  %v104_v29 = vld [vmem:[#allocation7 + $0xb0] sm:$0xff]  ;;  %v103_v31 = vld [vmem:[#allocation7 + $0xa8] sm:$0xff]  ;;  %v98_v32 = vld [vmem:[#allocation7 + $0x80] sm:$0xff] }
  0x2e   :  { %2329 = vmatprep.subr.bf16.mxu0 %v3159_v22  ;;  %v102_v33 = vld [vmem:[#allocation7 + $0xa0] sm:$0xff]  ;;  %v3168_v34 = vpack.c.bf16 %v104_v29, %v100_v28  ;;  %v3170_v35 = vpack.c.bf16 %v103_v31, %v99_v30  ;;  %v109_v36 = vld [vmem:[#allocation7 + $0xd8] sm:$0xff]  ;;  %v108_v38 = vld [vmem:[#allocation7 + $0xd0] sm:$0xff]  ;;  %p3064_p6 = pnand %p3063_p5, %p3057_p2 }
  0x2f   :  { %2363 = vmatpush1.bf16.msra.mxu1 %v3156_v18  ;;  %v113_v37 = vld [vmem:[#allocation7 + $0xf8] sm:$0xff]  ;;  %v3174_v39 = vpack.c.bf16 %v102_v33, %v98_v32  ;;  %v112_v41 = vld [vmem:[#allocation7 + $0xf0] sm:$0xff]  ;;  %v107_v42 = vld [vmem:[#allocation7 + $0xc8] sm:$0xff] }
  0x30   :  { %2331 = vmatpush1.bf16.msra.mxu0 %v3162_v26  ;;  %2365 = vmatprep.subr.bf16.mxu1 %v3164_v27  ;;  %v3176_v40 = vpack.c.bf16 %v113_v37, %v109_v36  ;;  %v111_v43 = vld [vmem:[#allocation7 + $0xe8] sm:$0xff]  ;;  %v106_v45 = vld [vmem:[#allocation7 + $0xc0] sm:$0xff]  ;;  %v117_v47 = vld [vmem:[#allocation7 + $0x118] sm:$0xff]  ;;  %v3182_v49 = vpack.c.bf16 %v112_v41, %v108_v38 }
  0x31   :  { %2333 = vmatprep.subr.bf16.mxu0 %v3170_v35  ;;  %v3179_v44 = vpack.c.bf16 %v111_v43, %v107_v42  ;;  %v110_v46 = vld [vmem:[#allocation7 + $0xe0] sm:$0xff]  ;;  %v121_v48 = vld [vmem:[#allocation7 + $0x138] sm:$0xff]  ;;  %v115_v50 = vld [vmem:[#allocation7 + $0x108] sm:$0xff] }
  0x32   :  { %v119_v51 = vld [vmem:[#allocation7 + $0x128] sm:$0xff]  ;;  %v3186_v52 = vpack.c.bf16 %v110_v46, %v106_v45  ;;  %v3188_v53 = vpack.c.bf16 %v121_v48, %v117_v47  ;;  %v116_v54 = vld [vmem:[#allocation7 + $0x110] sm:$0xff]  ;;  %v114_v56 = vld [vmem:[#allocation7 + $0x100] sm:$0xff] }
  0x33   :  { %2367 = vmatpush1.bf16.msra.mxu1 %v3168_v34  ;;  %v120_v55 = vld [vmem:[#allocation7 + $0x130] sm:$0xff]  ;;  %v3191_v57 = vpack.c.bf16 %v119_v51, %v115_v50  ;;  %v118_v58 = vld [vmem:[#allocation7 + $0x120] sm:$0xff]  ;;  %v125_v59 = vld [vmem:[#allocation7 + $0x158] sm:$0xff] }
  0x34   :  { %2335 = vmatpush1.bf16.msra.mxu0 %v3174_v39  ;;  %2369 = vmatprep.subr.bf16.mxu1 %v3176_v40  ;;  %v129_v60 = vld [vmem:[#allocation7 + $0x178] sm:$0xff]  ;;  %v123_v61 = vld [vmem:[#allocation7 + $0x148] sm:$0xff]  ;;  %v3194_v63 = vpack.c.bf16 %v120_v55, %v116_v54  ;;  %v3198_v1 = vpack.c.bf16 %v118_v58, %v114_v56  ;;  %v124_v3 = vld [vmem:[#allocation7 + $0x150] sm:$0xff] }
  0x35   :  { %2337 = vmatprep.subr.bf16.mxu0 %v3179_v44  ;;  %v127_v62 = vld [vmem:[#allocation7 + $0x168] sm:$0xff]  ;;  %v3200_v2 = vpack.c.bf16 %v129_v60, %v125_v59  ;;  %v128_v5 = vld [vmem:[#allocation7 + $0x170] sm:$0xff]  ;;  %v122_v6 = vld [vmem:[#allocation7 + $0x140] sm:$0xff] }
  0x36   :  { %v3203_v7 = vpack.c.bf16 %v127_v62, %v123_v61  ;;  %v126_v10 = vld [vmem:[#allocation7 + $0x160] sm:$0xff]  ;;  %v133_v11 = vld [vmem:[#allocation7 + $0x198] sm:$0xff]  ;;  %v131_v14 = vld [vmem:[#allocation7 + $0x188] sm:$0xff]  ;;  %v3206_v16 = vpack.c.bf16 %v128_v5, %v124_v3 }
  0x37   :  { %2371 = vmatpush1.bf16.msra.mxu1 %v3182_v49  ;;  %v137_v12 = vld [vmem:[#allocation7 + $0x1b8] sm:$0xff]  ;;  %v135_v15 = vld [vmem:[#allocation7 + $0x1a8] sm:$0xff]  ;;  %v3210_v19 = vpack.c.bf16 %v126_v10, %v122_v6  ;;  %v132_v21 = vld [vmem:[#allocation7 + $0x190] sm:$0xff] }
  0x38   :  { %2339 = vmatpush1.bf16.msra.mxu0 %v3186_v52  ;;  %2373 = vmatprep.subr.bf16.mxu1 %v3188_v53  ;;  %v3212_v20 = vpack.c.bf16 %v137_v12, %v133_v11  ;;  %v136_v23 = vld [vmem:[#allocation7 + $0x1b0] sm:$0xff]  ;;  %v130_v24 = vld [vmem:[#allocation7 + $0x180] sm:$0xff]  ;;  %v3215_v25 = vpack.c.bf16 %v135_v15, %v131_v14  ;;  %v141_v29 = vld [vmem:[#allocation7 + $0x1d8] sm:$0xff] }
  0x39   :  { %2341 = vmatprep.subr.bf16.mxu0 %v3191_v57  ;;  %v134_v28 = vld [vmem:[#allocation7 + $0x1a0] sm:$0xff]  ;;  %v145_v30 = vld [vmem:[#allocation7 + $0x1f8] sm:$0xff]  ;;  %v139_v31 = vld [vmem:[#allocation7 + $0x1c8] sm:$0xff]  ;;  %v3218_v33 = vpack.c.bf16 %v136_v23, %v132_v21 }
  0x3a   :  { %v143_v32 = vld [vmem:[#allocation7 + $0x1e8] sm:$0xff]  ;;  %v3222_v36 = vpack.c.bf16 %v134_v28, %v130_v24  ;;  %v3224_v37 = vpack.c.bf16 %v145_v30, %v141_v29  ;;  %v140_v38 = vld [vmem:[#allocation7 + $0x1d0] sm:$0xff]  ;;  %v138_v43 = vld [vmem:[#allocation7 + $0x1c0] sm:$0xff] }
  0x3b   :  { %2375 = vmatpush1.bf16.msra.mxu1 %v3194_v63  ;;  %v144_v41 = vld [vmem:[#allocation7 + $0x1f0] sm:$0xff]  ;;  %v3227_v42 = vpack.c.bf16 %v143_v32, %v139_v31  ;;  %v142_v45 = vld [vmem:[#allocation7 + $0x1e0] sm:$0xff]  ;;  %v78_v54 = vld [vmem:[#allocation4 + $0x8] sm:$0xff] }
  0x3c   :  { %2343 = vmatpush1.bf16.msra.mxu0 %v3198_v1  ;;  %2377 = vmatprep.subr.bf16.mxu1 %v3200_v2  ;;  %v3230_v46 = vpack.c.bf16 %v144_v41, %v140_v38  ;;  %v3234_v47 = vpack.c.bf16 %v142_v45, %v138_v43  ;;  %v79_v48 = vld [vmem:[#allocation4 + $0x10] sm:$0xff]  ;;  %v77_v50 = vld [vmem:[#allocation4] sm:$0xff]  ;;  %v80_v6 = vld [vmem:[#allocation4 + $0x18] sm:$0xff] }
  0x3d   :  { %2345 = vmatprep.subr.bf16.mxu0 %v3203_v7 }
  0x3f   :  { %2379 = vmatpush1.bf16.msra.mxu1 %v3206_v16 }
  0x40   :  { %2347 = vmatpush1.bf16.msra.mxu0 %v3210_v19  ;;  %2381 = vmatprep.subr.bf16.mxu1 %v3212_v20 }
  0x41   :  { %2349 = vmatprep.subr.bf16.mxu0 %v3215_v25 }
  0x43   :  { %2383 = vmatpush1.bf16.msra.mxu1 %v3218_v33 }
  0x44   :  { %2351 = vmatpush1.bf16.msra.mxu0 %v3222_v36  ;;  %2385 = vmatprep.subr.bf16.mxu1 %v3224_v37 }
  0x45   :  { %2353 = vmatprep.subr.bf16.mxu0 %v3227_v42 }
  0x47   :  { %2387 = vmatpush1.bf16.msra.mxu1 %v3230_v46 }
  0x48   :  { %2355 = vmatpush1.bf16.msra.mxu0 %v3234_v47  ;;  %2421 = vmatprep.subr.bf16.mxu1 %v3143_v4 }
  0x49   :  { %2389 = vmatprep.subr.bf16.mxu0 %v3147_v9 }
  0x4a   :  { %282 = vmatmul.mubr.f32.vlgmr.msra.gmra.mrb[0].mxu1 %v3088_v0 }
  0x4b   :  { %211 = vmatmul.mubr.f32.vlgmr.msra.gmra.mrb[0].mxu0 %v3088_v0  ;;  %2423 = vmatpush1.bf16.msra.mxu1 %v3145_v8 }
  0x4c   :  { %2391 = vmatpush1.bf16.msra.mxu0 %v3150_v13  ;;  %2425 = vmatprep.subr.bf16.mxu1 %v3154_v17 }
  0x4d   :  { %2393 = vmatprep.subr.bf16.mxu0 %v3159_v22  ;;  %466 = vmatprep.mubr.f32.mxu0 %v3088_v0 }
  0x4e   :  { %537 = vmatprep.mubr.f32.mxu1 %v3088_v0 }
  0x4f   :  { %2427 = vmatpush1.bf16.msra.mxu1 %v3156_v18 }
  0x50   :  { %2395 = vmatpush1.bf16.msra.mxu0 %v3162_v26  ;;  %2429 = vmatprep.subr.bf16.mxu1 %v3164_v27 }
  0x51   :  { %2397 = vmatprep.subr.bf16.mxu0 %v3170_v35 }
  0x53   :  { %2431 = vmatpush1.bf16.msra.mxu1 %v3168_v34 }
  0x54   :  { %2399 = vmatpush1.bf16.msra.mxu0 %v3174_v39  ;;  %2433 = vmatprep.subr.bf16.mxu1 %v3176_v40 }
  0x55   :  { %2401 = vmatprep.subr.bf16.mxu0 %v3179_v44 }
  0x57   :  { %2435 = vmatpush1.bf16.msra.mxu1 %v3182_v49 }
  0x58   :  { %2403 = vmatpush1.bf16.msra.mxu0 %v3186_v52  ;;  %2437 = vmatprep.subr.bf16.mxu1 %v3188_v53 }
  0x59   :  { %2405 = vmatprep.subr.bf16.mxu0 %v3191_v57 }
  0x5b   :  { %2439 = vmatpush1.bf16.msra.mxu1 %v3194_v63 }
  0x5c   :  { %2407 = vmatpush1.bf16.msra.mxu0 %v3198_v1  ;;  %2441 = vmatprep.subr.bf16.mxu1 %v3200_v2 }
  0x5d   :  { %2409 = vmatprep.subr.bf16.mxu0 %v3203_v7 }
  0x5f   :  { %2443 = vmatpush1.bf16.msra.mxu1 %v3206_v16 }
  0x60   :  { %2411 = vmatpush1.bf16.msra.mxu0 %v3210_v19  ;;  %2445 = vmatprep.subr.bf16.mxu1 %v3212_v20 }
  0x61   :  { %2413 = vmatprep.subr.bf16.mxu0 %v3215_v25 }
  0x63   :  { %2447 = vmatpush1.bf16.msra.mxu1 %v3218_v33 }
  0x64   :  { %2415 = vmatpush1.bf16.msra.mxu0 %v3222_v36  ;;  %2449 = vmatprep.subr.bf16.mxu1 %v3224_v37 }
  0x65   :  { %2417 = vmatprep.subr.bf16.mxu0 %v3227_v42 }
  0x67   :  { %2451 = vmatpush1.bf16.msra.mxu1 %v3230_v46 }
  0x68   :  { %2419 = vmatpush1.bf16.msra.mxu0 %v3234_v47  ;;  %2485 = vmatprep.subr.bf16.mxu1 %v3143_v4 }
  0x69   :  { %2453 = vmatprep.subr.bf16.mxu0 %v3147_v9 }
 0x11d   :  { %v283_v51 = vpop.f32.mrb[0].mxu1 }
 0x11e   :  { %v290_v55 = vadd.f32 %v283_v51, %v79_v48  ;;  %v285_v56 = vpop.f32.mrb[1].mxu1  ;;  %v212_v58 = vpop.f32.mrb[0].mxu0 }
 0x11f   :  { %v288_v59 = vadd.f32 %v212_v58, %v77_v50  ;;  %v214_v60 = vpop.f32.mrb[1].mxu0  ;;  %v291_v10 = vadd.f32 %v285_v56, %v80_v6  ;;  %v335_v56 = vld [vmem:[#allocation4 + $0x30] sm:$0xff]  ;;  %v334_v58 = vld [vmem:[#allocation4 + $0x28] sm:$0xff] }
 0x120   :  { %v2241_v61 = vmul.f32 -1.442695, %v290_v55  ;;  %v289_v62 = vadd.f32 %v214_v60, %v78_v54  ;;  %v333_v55 = vld [vmem:[#allocation4 + $0x20] sm:$0xff] }
 0x121   :  { %v2239_v3 = vmul.f32 -1.442695, %v288_v59  ;;  %v2242_v12 = vmul.f32 -1.442695, %v291_v10 }
 0x122   :  { %2868 = vpow2.f32 %v2241_v61  ;;  %v2240_v5 = vmul.f32 -1.442695, %v289_v62 }
 0x123   :  { %2870 = vpow2.f32 %v2239_v3 }
 0x124   :  { %2872 = vpow2.f32 %v2240_v5 }
 0x12c   :  { %v2869_v11 = vpop.eup %2868 }
 0x12d   :  { %v306_v14 = vadd.f32 1.0, %v2869_v11  ;;  %v2871_v15 = vpop.eup %2870 }
 0x12e   :  { %v2873_v21 = vpop.eup %2872  ;;  %v304_v23 = vadd.f32 1.0, %v2871_v15 }
 0x12f   :  { %2874 = vrcp.f32 %v306_v14  ;;  %v305_v24 = vadd.f32 1.0, %v2873_v21  ;;  %v336_v14 = vld [vmem:[#allocation4 + $0x38] sm:$0xff] }
 0x130   :  { %2876 = vpow2.f32 %v2242_v12 }
 0x131   :  { %2878 = vrcp.f32 %v304_v23 }
 0x132   :  { %2880 = vrcp.f32 %v305_v24 }
 0x139   :  { %v2875_v28 = vpop.eup %2874 }
 0x13a   :  { %v2877_v29 = vpop.eup %2876  ;;  %v318_v30 = vmul.f32 2.0, %v2875_v28 }
 0x13b   :  { %v2879_v31 = vpop.eup %2878  ;;  %v307_v41 = vadd.f32 1.0, %v2877_v29 }
 0x13c   :  { %v2881_v32 = vpop.eup %2880  ;;  %v322_v38 = vadd.f32 -1.0, %v318_v30 }
 0x13d   :  { %v325_v43 = vmul.f32 0.0, %v2881_v32  ;;  %2882 = vrcp.f32 %v307_v41 }
 0x13e   :  { %v326_v45 = vmul.f32 %v2879_v31, %v322_v38 }
 0x140   :  { %v3277_v48 = vadd.f32 %v326_v45, %v325_v43 }
 0x142   :  { %2884 = vtanh.f32 %v3277_v48 }
 0x147   :  { %v2883_v50 = vpop.eup %2882 }
 0x14c   :  { %v2885_v51 = vpop.eup %2884 }
 0x14d   :  { %v329_v54 = vmul.f32 %v2885_v51, %v2883_v50 }
 0x14f   :  { %467 = vmatmul.mubr.f32.vlgmr.msra.gmra.mrb[2].mxu0 %v329_v54  ;;  %538 = vmatmul.mubr.f32.vlgmr.msra.gmra.mrb[2].mxu1 %v329_v54 }
 0x150   :  { %2455 = vmatpush1.bf16.msra.mxu0 %v3150_v13  ;;  %2487 = vmatpush1.bf16.msra.mxu1 %v3145_v8 }
 0x151   :  { %2457 = vmatprep.subr.bf16.mxu0 %v3159_v22  ;;  %2489 = vmatprep.subr.bf16.mxu1 %v3154_v17 }
 0x152   :  { %722 = vmatprep.mubr.f32.mxu0 %v3088_v0  ;;  %793 = vmatprep.mubr.f32.mxu1 %v3088_v0 }
 0x154   :  { %2459 = vmatpush1.bf16.msra.mxu0 %v3162_v26  ;;  %2491 = vmatpush1.bf16.msra.mxu1 %v3156_v18 }
 0x155   :  { %2461 = vmatprep.subr.bf16.mxu0 %v3170_v35  ;;  %2493 = vmatprep.subr.bf16.mxu1 %v3164_v27 }
 0x158   :  { %2463 = vmatpush1.bf16.msra.mxu0 %v3174_v39  ;;  %2495 = vmatpush1.bf16.msra.mxu1 %v3168_v34 }
 0x159   :  { %2465 = vmatprep.subr.bf16.mxu0 %v3179_v44  ;;  %2497 = vmatprep.subr.bf16.mxu1 %v3176_v40 }
 0x15c   :  { %2467 = vmatpush1.bf16.msra.mxu0 %v3186_v52  ;;  %2499 = vmatpush1.bf16.msra.mxu1 %v3182_v49 }
 0x15d   :  { %2469 = vmatprep.subr.bf16.mxu0 %v3191_v57  ;;  %2501 = vmatprep.subr.bf16.mxu1 %v3188_v53 }
 0x160   :  { %2471 = vmatpush1.bf16.msra.mxu0 %v3198_v1  ;;  %2503 = vmatpush1.bf16.msra.mxu1 %v3194_v63 }
 0x161   :  { %2473 = vmatprep.subr.bf16.mxu0 %v3203_v7  ;;  %2505 = vmatprep.subr.bf16.mxu1 %v3200_v2 }
 0x164   :  { %2475 = vmatpush1.bf16.msra.mxu0 %v3210_v19  ;;  %2507 = vmatpush1.bf16.msra.mxu1 %v3206_v16 }
 0x165   :  { %2477 = vmatprep.subr.bf16.mxu0 %v3215_v25  ;;  %2509 = vmatprep.subr.bf16.mxu1 %v3212_v20 }
 0x168   :  { %2479 = vmatpush1.bf16.msra.mxu0 %v3222_v36  ;;  %2511 = vmatpush1.bf16.msra.mxu1 %v3218_v33 }
 0x169   :  { %2481 = vmatprep.subr.bf16.mxu0 %v3227_v42  ;;  %2513 = vmatprep.subr.bf16.mxu1 %v3224_v37 }
 0x16c   :  { %2483 = vmatpush1.bf16.msra.mxu0 %v3234_v47  ;;  %2515 = vmatpush1.bf16.msra.mxu1 %v3230_v46 }
 0x16d   :  { %2517 = vmatprep.subr.bf16.mxu0 %v3147_v9  ;;  %2549 = vmatprep.subr.bf16.mxu1 %v3143_v4 }
 0x222   :  { %v468_v59 = vpop.f32.mrb[2].mxu0  ;;  %v539_v60 = vpop.f32.mrb[2].mxu1 }
 0x223   :  { %v544_v61 = vadd.f32 %v468_v59, %v333_v55  ;;  %v546_v62 = vadd.f32 %v539_v60, %v335_v56  ;;  %v470_v3 = vpop.f32.mrb[3].mxu0  ;;  %v541_v5 = vpop.f32.mrb[3].mxu1 }
 0x224   :  { %v545_v6 = vadd.f32 %v470_v3, %v334_v58  ;;  %v547_v9 = vadd.f32 %v541_v5, %v336_v14  ;;  %v1107_v3 = vld [vmem:[#allocation7 + $0x8] sm:$0xff]  ;;  %v1110_v14 = vld [vmem:[#allocation7 + $0x20] sm:$0xff] }
 0x225   :  { %v2243_v10 = vmul.f32 -1.442695, %v544_v61  ;;  %v2245_v11 = vmul.f32 -1.442695, %v546_v62  ;;  %v1111_v5 = vld [vmem:[#allocation7 + $0x28] sm:$0xff] }
 0x226   :  { %v2244_v12 = vmul.f32 -1.442695, %v545_v6  ;;  %v2246_v21 = vmul.f32 -1.442695, %v547_v9  ;;  %v1109_v6 = vld [vmem:[#allocation7 + $0x18] sm:$0xff] }
 0x227   :  { %2886 = vpow2.f32 %v2243_v10  ;;  %v3356_v10 = vpack.c.bf16 %v1111_v5, %v1107_v3  ;;  %v1149_v3 = vld [vmem:[#allocation7 + $0x158] sm:$0xff] }
 0x228   :  { %2888 = vpow2.f32 %v2245_v11  ;;  %v1113_v11 = vld [vmem:[#allocation7 + $0x38] sm:$0xff] }
 0x229   :  { %2890 = vpow2.f32 %v2244_v12  ;;  %v1106_v12 = vld [vmem:[#allocation7] sm:$0xff]  ;;  %v3358_v9 = vpack.c.bf16 %v1113_v11, %v1109_v6  ;;  %v1153_v6 = vld [vmem:[#allocation7 + $0x178] sm:$0xff] }
 0x22a   :  { %v1146_v11 = vld [vmem:[#allocation7 + $0x140] sm:$0xff] }
 0x231   :  { %v2887_v15 = vpop.eup %2886 }
 0x232   :  { %v2889_v4 = vpop.eup %2888  ;;  %v560_v29 = vadd.f32 1.0, %v2887_v15  ;;  %v3360_v15 = vpack.c.bf16 %v1110_v14, %v1106_v12  ;;  %v1150_v12 = vld [vmem:[#allocation7 + $0x160] sm:$0xff]  ;;  %v3418_v14 = vpack.c.bf16 %v1153_v6, %v1149_v3 }
 0x233   :  { %v2891_v23 = vpop.eup %2890  ;;  %v562_v24 = vadd.f32 1.0, %v2889_v4  ;;  %v1108_v4 = vld [vmem:[#allocation7 + $0x10] sm:$0xff] }
 0x234   :  { %v561_v28 = vadd.f32 1.0, %v2891_v23 }
 0x235   :  { %2892 = vrcp.f32 %v562_v24  ;;  %v1115_v24 = vld [vmem:[#allocation7 + $0x48] sm:$0xff] }
 0x236   :  { %2894 = vpow2.f32 %v2246_v21  ;;  %v1112_v21 = vld [vmem:[#allocation7 + $0x30] sm:$0xff] }
 0x237   :  { %2896 = vrcp.f32 %v561_v28  ;;  %v3363_v23 = vpack.c.bf16 %v1112_v21, %v1108_v4  ;;  %v1119_v28 = vld [vmem:[#allocation7 + $0x68] sm:$0xff]  ;;  %v3420_v4 = vpack.c.bf16 %v1150_v12, %v1146_v11  ;;  %v1148_v21 = vld [vmem:[#allocation7 + $0x150] sm:$0xff] }
 0x238   :  { %2898 = vrcp.f32 %v560_v29  ;;  %v1117_v29 = vld [vmem:[#allocation7 + $0x58] sm:$0xff] }
 0x23f   :  { %v2893_v30 = vpop.eup %2892 }
 0x240   :  { %v2895_v31 = vpop.eup %2894  ;;  %v574_v32 = vmul.f32 2.0, %v2893_v30  ;;  %v3368_v30 = vpack.c.bf16 %v1119_v28, %v1115_v24  ;;  %v1152_v24 = vld [vmem:[#allocation7 + $0x170] sm:$0xff]  ;;  %v1155_v28 = vld [vmem:[#allocation7 + $0x188] sm:$0xff] }
 0x241   :  { %v2897_v38 = vpop.eup %2896  ;;  %v563_v45 = vadd.f32 1.0, %v2895_v31  ;;  %v1121_v31 = vld [vmem:[#allocation7 + $0x78] sm:$0xff] }
 0x242   :  { %v578_v41 = vadd.f32 -1.0, %v574_v32  ;;  %v2899_v43 = vpop.eup %2898  ;;  %v581_v51 = vmul.f32 %v2897_v38, %v3277_v48  ;;  %v1114_v32 = vld [vmem:[#allocation7 + $0x40] sm:$0xff] }
 0x243   :  { %2900 = vrcp.f32 %v563_v45  ;;  %v1118_v38 = vld [vmem:[#allocation7 + $0x60] sm:$0xff]  ;;  %v1116_v45 = vld [vmem:[#allocation7 + $0x50] sm:$0xff] }
 0x244   :  { %v582_v50 = vmul.f32 %v2899_v43, %v578_v41  ;;  %v3370_v41 = vpack.c.bf16 %v1121_v31, %v1117_v29  ;;  %v3372_v43 = vpack.c.bf16 %v1118_v38, %v1114_v32  ;;  %v3423_v29 = vpack.c.bf16 %v1152_v24, %v1148_v21  ;;  %v1159_v31 = vld [vmem:[#allocation7 + $0x1a8] sm:$0xff]  ;;  %v1157_v32 = vld [vmem:[#allocation7 + $0x198] sm:$0xff] }
 0x245   :  { %v1161_v38 = vld [vmem:[#allocation7 + $0x1b8] sm:$0xff] }
 0x246   :  { %v3315_v54 = vadd.f32 %v582_v50, %v581_v51  ;;  %v1120_v50 = vld [vmem:[#allocation7 + $0x70] sm:$0xff]  ;;  %v848_v24 = vld [vmem:[#allocation4 + $0x78] sm:$0xff] }
 0x247   :  { %v3375_v51 = vpack.c.bf16 %v1120_v50, %v1116_v45  ;;  %v3426_v45 = vpack.c.bf16 %v1159_v31, %v1155_v28  ;;  %v3428_v50 = vpack.c.bf16 %v1161_v38, %v1157_v32 }
 0x248   :  { %2902 = vtanh.f32 %v3315_v54 }
 0x24d   :  { %v2901_v55 = vpop.eup %2900 }
 0x252   :  { %v2903_v56 = vpop.eup %2902 }
 0x253   :  { %v585_v58 = vmul.f32 %v2903_v56, %v2901_v55  ;;  %v1127_v55 = vld [vmem:[#allocation7 + $0xa8] sm:$0xff]  ;;  %v1125_v56 = vld [vmem:[#allocation7 + $0x98] sm:$0xff] }
 0x255   :  { %723 = vmatmul.mubr.f32.vlgmr.msra.gmra.mrb[4].mxu0 %v585_v58  ;;  %794 = vmatmul.mubr.f32.vlgmr.msra.gmra.mrb[4].mxu1 %v585_v58 }
 0x256   :  { %2519 = vmatpush1.bf16.msra.mxu0 %v3150_v13  ;;  %2551 = vmatpush1.bf16.msra.mxu1 %v3145_v8  ;;  %v589_v8 = vld [vmem:[#allocation4 + $0x40] sm:$0xff]  ;;  %v591_v13 = vld [vmem:[#allocation4 + $0x50] sm:$0xff] }
 0x257   :  { %2521 = vmatprep.subr.bf16.mxu0 %v3159_v22  ;;  %2553 = vmatprep.subr.bf16.mxu1 %v3154_v17  ;;  %v590_v17 = vld [vmem:[#allocation4 + $0x48] sm:$0xff] }
 0x258   :  { %978 = vmatprep.mubr.f32.mxu0 %v3088_v0  ;;  %1049 = vmatprep.mubr.f32.mxu1 %v3088_v0 }
 0x25a   :  { %2523 = vmatpush1.bf16.msra.mxu0 %v3162_v26  ;;  %2555 = vmatpush1.bf16.msra.mxu1 %v3156_v18 }
 0x25b   :  { %2525 = vmatprep.subr.bf16.mxu0 %v3170_v35  ;;  %2557 = vmatprep.subr.bf16.mxu1 %v3164_v27 }
 0x25e   :  { %2527 = vmatpush1.bf16.msra.mxu0 %v3174_v39  ;;  %2559 = vmatpush1.bf16.msra.mxu1 %v3168_v34 }
 0x25f   :  { %2529 = vmatprep.subr.bf16.mxu0 %v3179_v44  ;;  %2561 = vmatprep.subr.bf16.mxu1 %v3176_v40 }
 0x262   :  { %2531 = vmatpush1.bf16.msra.mxu0 %v3186_v52  ;;  %2563 = vmatpush1.bf16.msra.mxu1 %v3182_v49  ;;  %v592_v52 = vld [vmem:[#allocation4 + $0x58] sm:$0xff] }
 0x263   :  { %2533 = vmatprep.subr.bf16.mxu0 %v3191_v57  ;;  %2565 = vmatprep.subr.bf16.mxu1 %v3188_v53 }
 0x266   :  { %2535 = vmatpush1.bf16.msra.mxu0 %v3198_v1  ;;  %2567 = vmatpush1.bf16.msra.mxu1 %v3194_v63 }
 0x267   :  { %2537 = vmatprep.subr.bf16.mxu0 %v3203_v7  ;;  %2569 = vmatprep.subr.bf16.mxu1 %v3200_v2 }
 0x26a   :  { %2539 = vmatpush1.bf16.msra.mxu0 %v3210_v19  ;;  %2571 = vmatpush1.bf16.msra.mxu1 %v3206_v16 }
 0x26b   :  { %2541 = vmatprep.subr.bf16.mxu0 %v3215_v25  ;;  %2573 = vmatprep.subr.bf16.mxu1 %v3212_v20 }
 0x26e   :  { %2543 = vmatpush1.bf16.msra.mxu0 %v3222_v36  ;;  %2575 = vmatpush1.bf16.msra.mxu1 %v3218_v33 }
 0x26f   :  { %2545 = vmatprep.subr.bf16.mxu0 %v3227_v42  ;;  %2577 = vmatprep.subr.bf16.mxu1 %v3224_v37 }
 0x272   :  { %2547 = vmatpush1.bf16.msra.mxu0 %v3234_v47  ;;  %2579 = vmatpush1.bf16.msra.mxu1 %v3230_v46 }
 0x273   :  { %2581 = vmatprep.subr.bf16.mxu0 %v3356_v10  ;;  %2613 = vmatprep.subr.bf16.mxu1 %v3358_v9 }
 0x328   :  { %v724_v18 = vpop.f32.mrb[4].mxu0  ;;  %v795_v22 = vpop.f32.mrb[4].mxu1 }
 0x329   :  { %v800_v26 = vadd.f32 %v724_v18, %v589_v8  ;;  %v802_v27 = vadd.f32 %v795_v22, %v591_v13  ;;  %v726_v34 = vpop.f32.mrb[5].mxu0  ;;  %v797_v35 = vpop.f32.mrb[5].mxu1  ;;  %v1129_v8 = vld [vmem:[#allocation7 + $0xb8] sm:$0xff]  ;;  %v1122_v13 = vld [vmem:[#allocation7 + $0x80] sm:$0xff] }
 0x32a   :  { %v801_v39 = vadd.f32 %v726_v34, %v590_v17  ;;  %v803_v53 = vadd.f32 %v797_v35, %v592_v52  ;;  %v1126_v17 = vld [vmem:[#allocation7 + $0xa0] sm:$0xff]  ;;  %v3382_v18 = vpack.c.bf16 %v1129_v8, %v1125_v56  ;;  %v1131_v35 = vld [vmem:[#allocation7 + $0xc8] sm:$0xff]  ;;  %v1156_v56 = vld [vmem:[#allocation7 + $0x190] sm:$0xff] }
 0x32b   :  { %v2247_v40 = vmul.f32 -1.442695, %v800_v26  ;;  %v2249_v44 = vmul.f32 -1.442695, %v802_v27  ;;  %v3384_v22 = vpack.c.bf16 %v1126_v17, %v1122_v13  ;;  %v1124_v26 = vld [vmem:[#allocation7 + $0x90] sm:$0xff]  ;;  %v1130_v52 = vld [vmem:[#allocation7 + $0xc0] sm:$0xff] }
 0x32c   :  { %v2248_v49 = vmul.f32 -1.442695, %v801_v39  ;;  %v2250_v1 = vmul.f32 -1.442695, %v803_v53  ;;  %v1128_v27 = vld [vmem:[#allocation7 + $0xb0] sm:$0xff]  ;;  %v1135_v39 = vld [vmem:[#allocation7 + $0xe8] sm:$0xff] }
 0x32d   :  { %2904 = vpow2.f32 %v2247_v40  ;;  %v3387_v34 = vpack.c.bf16 %v1128_v27, %v1124_v26  ;;  %v1133_v40 = vld [vmem:[#allocation7 + $0xd8] sm:$0xff]  ;;  %v1134_v53 = vld [vmem:[#allocation7 + $0xe0] sm:$0xff]  ;;  %v1160_v13 = vld [vmem:[#allocation7 + $0x1b0] sm:$0xff] }
 0x32e   :  { %2906 = vpow2.f32 %v2249_v44  ;;  %v3392_v44 = vpack.c.bf16 %v1135_v39, %v1131_v35  ;;  %v1163_v17 = vld [vmem:[#allocation7 + $0x1c8] sm:$0xff]  ;;  %v3435_v27 = vpack.c.bf16 %v1160_v13, %v1156_v56  ;;  %v1165_v39 = vld [vmem:[#allocation7 + $0x1d8] sm:$0xff] }
 0x32f   :  { %2908 = vpow2.f32 %v2248_v49  ;;  %v1137_v49 = vld [vmem:[#allocation7 + $0xf8] sm:$0xff]  ;;  %v1167_v26 = vld [vmem:[#allocation7 + $0x1e8] sm:$0xff] }
 0x330   :  { %v3437_v35 = vpack.c.bf16 %v1167_v26, %v1163_v17 }
 0x337   :  { %v2905_v57 = vpop.eup %2904 }
 0x338   :  { %v2907_v63 = vpop.eup %2906  ;;  %v816_v19 = vadd.f32 1.0, %v2905_v57  ;;  %v3394_v57 = vpack.c.bf16 %v1137_v49, %v1133_v40  ;;  %v1169_v40 = vld [vmem:[#allocation7 + $0x1f8] sm:$0xff]  ;;  %v1162_v49 = vld [vmem:[#allocation7 + $0x1c0] sm:$0xff] }
 0x339   :  { %v2909_v2 = vpop.eup %2908  ;;  %v818_v7 = vadd.f32 1.0, %v2907_v63  ;;  %v3396_v63 = vpack.c.bf16 %v1134_v53, %v1130_v52  ;;  %v3440_v52 = vpack.c.bf16 %v1169_v40, %v1165_v39  ;;  %v1166_v53 = vld [vmem:[#allocation7 + $0x1e0] sm:$0xff] }
 0x33a   :  { %v817_v16 = vadd.f32 1.0, %v2909_v2  ;;  %v1136_v2 = vld [vmem:[#allocation7 + $0xf0] sm:$0xff] }
 0x33b   :  { %2910 = vrcp.f32 %v818_v7 }
 0x33c   :  { %2912 = vpow2.f32 %v2250_v1  ;;  %v1132_v1 = vld [vmem:[#allocation7 + $0xd0] sm:$0xff] }
 0x33d   :  { %2914 = vrcp.f32 %v817_v16  ;;  %v3399_v7 = vpack.c.bf16 %v1136_v2, %v1132_v1  ;;  %v1139_v16 = vld [vmem:[#allocation7 + $0x108] sm:$0xff]  ;;  %v1164_v1 = vld [vmem:[#allocation7 + $0x1d0] sm:$0xff] }
 0x33e   :  { %2916 = vrcp.f32 %v816_v19  ;;  %v1143_v19 = vld [vmem:[#allocation7 + $0x128] sm:$0xff]  ;;  %v1168_v2 = vld [vmem:[#allocation7 + $0x1f0] sm:$0xff] }
 0x345   :  { %v2911_v20 = vpop.eup %2910 }
 0x346   :  { %v2913_v25 = vpop.eup %2912  ;;  %v830_v33 = vmul.f32 2.0, %v2911_v20  ;;  %v1141_v20 = vld [vmem:[#allocation7 + $0x118] sm:$0xff] }
 0x347   :  { %v2915_v36 = vpop.eup %2914  ;;  %v819_v46 = vadd.f32 1.0, %v2913_v25  ;;  %v3404_v25 = vpack.c.bf16 %v1143_v19, %v1139_v16  ;;  %v3443_v16 = vpack.c.bf16 %v1166_v53, %v1162_v49  ;;  %v3447_v19 = vpack.c.bf16 %v1168_v2, %v1164_v1 }
 0x348   :  { %v834_v37 = vadd.f32 -1.0, %v830_v33  ;;  %v2917_v42 = vpop.eup %2916  ;;  %v837_v48 = vmul.f32 %v2915_v36, %v3315_v54  ;;  %v1123_v54 = vld [vmem:[#allocation7 + $0x88] sm:$0xff]  ;;  %v1145_v33 = vld [vmem:[#allocation7 + $0x138] sm:$0xff]  ;;  %v1138_v36 = vld [vmem:[#allocation7 + $0x100] sm:$0xff] }
 0x349   :  { %2918 = vrcp.f32 %v819_v46  ;;  %v3380_v58 = vpack.c.bf16 %v1127_v55, %v1123_v54  ;;  %v1154_v54 = vld [vmem:[#allocation7 + $0x180] sm:$0xff] }
 0x34a   :  { %v838_v47 = vmul.f32 %v2917_v42, %v834_v37  ;;  %v1142_v37 = vld [vmem:[#allocation7 + $0x120] sm:$0xff]  ;;  %v3406_v42 = vpack.c.bf16 %v1145_v33, %v1141_v20  ;;  %v847_v33 = vld [vmem:[#allocation4 + $0x70] sm:$0xff] }
 0x34b   :  { %v3408_v46 = vpack.c.bf16 %v1142_v37, %v1138_v36  ;;  %v1158_v55 = vld [vmem:[#allocation7 + $0x1a0] sm:$0xff]  ;;  %v846_v36 = vld [vmem:[#allocation4 + $0x68] sm:$0xff] }
 0x34c   :  { %v3351_v59 = vadd.f32 %v838_v47, %v837_v48  ;;  %v1140_v47 = vld [vmem:[#allocation7 + $0x110] sm:$0xff]  ;;  %v3431_v8 = vpack.c.bf16 %v1158_v55, %v1154_v54  ;;  %v845_v20 = vld [vmem:[#allocation4 + $0x60] sm:$0xff] }
 0x34d   :  { %v1144_v48 = vld [vmem:[#allocation7 + $0x130] sm:$0xff] }
 0x34e   :  { %2920 = vtanh.f32 %v3351_v59 }
 0x353   :  { %v2919_v60 = vpop.eup %2918 }
 0x358   :  { %v2921_v61 = vpop.eup %2920 }
 0x359   :  { %v841_v62 = vmul.f32 %v2921_v61, %v2919_v60  ;;  %v3411_v60 = vpack.c.bf16 %v1144_v48, %v1140_v47  ;;  %v1147_v61 = vld [vmem:[#allocation7 + $0x148] sm:$0xff] }
 0x35b   :  { %979 = vmatmul.mubr.f32.vlgmr.msra.gmra.mrb[6].mxu0 %v841_v62  ;;  %1050 = vmatmul.mubr.f32.vlgmr.msra.gmra.mrb[6].mxu1 %v841_v62  ;;  %v1151_v62 = vld [vmem:[#allocation7 + $0x168] sm:$0xff] }
 0x35c   :  { %1234 = vmatprep.mubr.f32.mxu0 %v3088_v0  ;;  %1305 = vmatprep.mubr.f32.mxu1 %v3088_v0  ;;  %v3415_v5 = vpack.c.bf16 %v1151_v62, %v1147_v61 }
 0x35d   :  { %2583 = vmatpush1.bf16.msra.mxu0 %v3360_v15  ;;  %2615 = vmatpush1.bf16.msra.mxu1 %v3363_v23 }
 0x35e   :  { %2585 = vmatprep.subr.bf16.mxu0 %v3368_v30  ;;  %2617 = vmatprep.subr.bf16.mxu1 %v3370_v41 }
 0x361   :  { %2587 = vmatpush1.bf16.msra.mxu0 %v3372_v43  ;;  %2619 = vmatpush1.bf16.msra.mxu1 %v3375_v51 }
 0x362   :  { %2589 = vmatprep.subr.bf16.mxu0 %v3380_v58  ;;  %2621 = vmatprep.subr.bf16.mxu1 %v3382_v18 }
 0x365   :  { %2591 = vmatpush1.bf16.msra.mxu0 %v3384_v22  ;;  %2623 = vmatpush1.bf16.msra.mxu1 %v3387_v34 }
 0x366   :  { %2593 = vmatprep.subr.bf16.mxu0 %v3392_v44  ;;  %2625 = vmatprep.subr.bf16.mxu1 %v3394_v57 }
 0x369   :  { %2595 = vmatpush1.bf16.msra.mxu0 %v3396_v63  ;;  %2627 = vmatpush1.bf16.msra.mxu1 %v3399_v7 }
 0x36a   :  { %2597 = vmatprep.subr.bf16.mxu0 %v3404_v25  ;;  %2629 = vmatprep.subr.bf16.mxu1 %v3406_v42 }
 0x36d   :  { %2599 = vmatpush1.bf16.msra.mxu0 %v3408_v46  ;;  %2631 = vmatpush1.bf16.msra.mxu1 %v3411_v60 }
 0x36e   :  { %2601 = vmatprep.subr.bf16.mxu0 %v3415_v5  ;;  %2633 = vmatprep.subr.bf16.mxu1 %v3418_v14 }
 0x371   :  { %2603 = vmatpush1.bf16.msra.mxu0 %v3420_v4  ;;  %2635 = vmatpush1.bf16.msra.mxu1 %v3423_v29 }
 0x372   :  { %2605 = vmatprep.subr.bf16.mxu0 %v3426_v45  ;;  %2637 = vmatprep.subr.bf16.mxu1 %v3428_v50 }
 0x375   :  { %2607 = vmatpush1.bf16.msra.mxu0 %v3431_v8  ;;  %2639 = vmatpush1.bf16.msra.mxu1 %v3435_v27 }
 0x376   :  { %2609 = vmatprep.subr.bf16.mxu0 %v3437_v35  ;;  %2641 = vmatprep.subr.bf16.mxu1 %v3440_v52 }
 0x379   :  { %2611 = vmatpush1.bf16.msra.mxu0 %v3443_v16  ;;  %2643 = vmatpush1.bf16.msra.mxu1 %v3447_v19 }
 0x37a   :  { %2645 = vmatprep.subr.bf16.mxu0 %v3356_v10  ;;  %2677 = vmatprep.subr.bf16.mxu1 %v3358_v9 }
 0x42e   :  { %v980_v37 = vpop.f32.mrb[6].mxu0  ;;  %v1051_v47 = vpop.f32.mrb[6].mxu1 }
 0x42f   :  { %v1056_v48 = vadd.f32 %v980_v37, %v845_v20  ;;  %v1058_v61 = vadd.f32 %v1051_v47, %v847_v33  ;;  %v982_v62 = vpop.f32.mrb[7].mxu0  ;;  %v1053_v3 = vpop.f32.mrb[7].mxu1 }
 0x430   :  { %v1057_v6 = vadd.f32 %v982_v62, %v846_v36  ;;  %v1059_v28 = vadd.f32 %v1053_v3, %v848_v24 }
 0x431   :  { %v2251_v11 = vmul.f32 -1.442695, %v1056_v48  ;;  %v2253_v12 = vmul.f32 -1.442695, %v1058_v61  ;;  %v1103_v48 = vld [vmem:[#allocation4 + $0x90] sm:$0xff]  ;;  %v1102_v61 = vld [vmem:[#allocation4 + $0x88] sm:$0xff] }
 0x432   :  { %v2252_v21 = vmul.f32 -1.442695, %v1057_v6  ;;  %v2254_v38 = vmul.f32 -1.442695, %v1059_v28 }
 0x433   :  { %2922 = vpow2.f32 %v2251_v11 }
 0x434   :  { %2924 = vpow2.f32 %v2253_v12 }
 0x435   :  { %2926 = vpow2.f32 %v2252_v21 }
 0x43d   :  { %v2923_v31 = vpop.eup %2922 }
 0x43e   :  { %v2925_v32 = vpop.eup %2924  ;;  %v1072_v13 = vadd.f32 1.0, %v2923_v31 }
 0x43f   :  { %v2927_v54 = vpop.eup %2926  ;;  %v1074_v55 = vadd.f32 1.0, %v2925_v32 }
 0x440   :  { %v1073_v56 = vadd.f32 1.0, %v2927_v54 }
 0x441   :  { %2928 = vrcp.f32 %v1074_v55 }
 0x442   :  { %2930 = vpow2.f32 %v2254_v38  ;;  %v1104_v38 = vld [vmem:[#allocation4 + $0x98] sm:$0xff] }
 0x443   :  { %2932 = vrcp.f32 %v1073_v56 }
 0x444   :  { %2934 = vrcp.f32 %v1072_v13 }
 0x44b   :  { %v2929_v17 = vpop.eup %2928 }
 0x44c   :  { %v2931_v26 = vpop.eup %2930  ;;  %v1086_v39 = vmul.f32 2.0, %v2929_v17 }
 0x44d   :  { %v2933_v40 = vpop.eup %2932  ;;  %v1075_v1 = vadd.f32 1.0, %v2931_v26 }
 0x44e   :  { %v1090_v49 = vadd.f32 -1.0, %v1086_v39  ;;  %v2935_v53 = vpop.eup %2934  ;;  %v1093_v20 = vmul.f32 %v2933_v40, %v3351_v59  ;;  %v1101_v59 = vld [vmem:[#allocation4 + $0x80] sm:$0xff] }
 0x44f   :  { %2936 = vrcp.f32 %v1075_v1 }
 0x450   :  { %v1094_v2 = vmul.f32 %v2935_v53, %v1090_v49 }
 0x452   :  { %v3455_v33 = vadd.f32 %v1094_v2, %v1093_v20 }
 0x454   :  { %2938 = vtanh.f32 %v3455_v33 }
 0x459   :  { %v2937_v36 = vpop.eup %2936 }
 0x45e   :  { %v2939_v37 = vpop.eup %2938 }
 0x45f   :  { %v1097_v47 = vmul.f32 %v2939_v37, %v2937_v36 }
 0x461   :  { %1235 = vmatmul.mubr.f32.vlgmr.msra.gmra.mrb[8].mxu0 %v1097_v47  ;;  %1306 = vmatmul.mubr.f32.vlgmr.msra.gmra.mrb[8].mxu1 %v1097_v47 }
 0x462   :  { %2647 = vmatpush1.bf16.msra.mxu0 %v3360_v15  ;;  %2679 = vmatpush1.bf16.msra.mxu1 %v3363_v23 }
 0x463   :  { %2649 = vmatprep.subr.bf16.mxu0 %v3368_v30  ;;  %2681 = vmatprep.subr.bf16.mxu1 %v3370_v41 }
 0x464   :  { %1490 = vmatprep.mubr.f32.mxu0 %v3088_v0  ;;  %1561 = vmatprep.mubr.f32.mxu1 %v3088_v0 }
 0x466   :  { %2651 = vmatpush1.bf16.msra.mxu0 %v3372_v43  ;;  %2683 = vmatpush1.bf16.msra.mxu1 %v3375_v51 }
 0x467   :  { %2653 = vmatprep.subr.bf16.mxu0 %v3380_v58  ;;  %2685 = vmatprep.subr.bf16.mxu1 %v3382_v18 }
 0x46a   :  { %2655 = vmatpush1.bf16.msra.mxu0 %v3384_v22  ;;  %2687 = vmatpush1.bf16.msra.mxu1 %v3387_v34 }
 0x46b   :  { %2657 = vmatprep.subr.bf16.mxu0 %v3392_v44  ;;  %2689 = vmatprep.subr.bf16.mxu1 %v3394_v57 }
 0x46e   :  { %2659 = vmatpush1.bf16.msra.mxu0 %v3396_v63  ;;  %2691 = vmatpush1.bf16.msra.mxu1 %v3399_v7 }
 0x46f   :  { %2661 = vmatprep.subr.bf16.mxu0 %v3404_v25  ;;  %2693 = vmatprep.subr.bf16.mxu1 %v3406_v42 }
 0x472   :  { %2663 = vmatpush1.bf16.msra.mxu0 %v3408_v46  ;;  %2695 = vmatpush1.bf16.msra.mxu1 %v3411_v60 }
 0x473   :  { %2665 = vmatprep.subr.bf16.mxu0 %v3415_v5  ;;  %2697 = vmatprep.subr.bf16.mxu1 %v3418_v14 }
 0x476   :  { %2667 = vmatpush1.bf16.msra.mxu0 %v3420_v4  ;;  %2699 = vmatpush1.bf16.msra.mxu1 %v3423_v29 }
 0x477   :  { %2669 = vmatprep.subr.bf16.mxu0 %v3426_v45  ;;  %2701 = vmatprep.subr.bf16.mxu1 %v3428_v50 }
 0x47a   :  { %2671 = vmatpush1.bf16.msra.mxu0 %v3431_v8  ;;  %2703 = vmatpush1.bf16.msra.mxu1 %v3435_v27 }
 0x47b   :  { %2673 = vmatprep.subr.bf16.mxu0 %v3437_v35  ;;  %2705 = vmatprep.subr.bf16.mxu1 %v3440_v52 }
 0x47e   :  { %2675 = vmatpush1.bf16.msra.mxu0 %v3443_v16  ;;  %2707 = vmatpush1.bf16.msra.mxu1 %v3447_v19 }
 0x47f   :  { %2709 = vmatprep.subr.bf16.mxu0 %v3356_v10  ;;  %2741 = vmatprep.subr.bf16.mxu1 %v3358_v9 }
 0x534   :  { %v1236_v62 = vpop.f32.mrb[8].mxu0  ;;  %v1307_v3 = vpop.f32.mrb[8].mxu1 }
 0x535   :  { %v1312_v6 = vadd.f32 %v1236_v62, %v1101_v59  ;;  %v1314_v11 = vadd.f32 %v1307_v3, %v1103_v48  ;;  %v1238_v12 = vpop.f32.mrb[9].mxu0  ;;  %v1309_v21 = vpop.f32.mrb[9].mxu1 }
 0x536   :  { %v1313_v24 = vadd.f32 %v1238_v12, %v1102_v61  ;;  %v1315_v54 = vadd.f32 %v1309_v21, %v1104_v38 }
 0x537   :  { %v2255_v28 = vmul.f32 -1.442695, %v1312_v6  ;;  %v2257_v31 = vmul.f32 -1.442695, %v1314_v11  ;;  %v1359_v6 = vld [vmem:[#allocation4 + $0xb0] sm:$0xff]  ;;  %v1358_v11 = vld [vmem:[#allocation4 + $0xa8] sm:$0xff] }
 0x538   :  { %v2256_v32 = vmul.f32 -1.442695, %v1313_v24  ;;  %v2258_v13 = vmul.f32 -1.442695, %v1315_v54 }
 0x539   :  { %2940 = vpow2.f32 %v2255_v28 }
 0x53a   :  { %2942 = vpow2.f32 %v2257_v31 }
 0x53b   :  { %2944 = vpow2.f32 %v2256_v32 }
 0x543   :  { %v2941_v55 = vpop.eup %2940 }
 0x544   :  { %v2943_v56 = vpop.eup %2942  ;;  %v1328_v40 = vadd.f32 1.0, %v2941_v55 }
 0x545   :  { %v2945_v17 = vpop.eup %2944  ;;  %v1330_v26 = vadd.f32 1.0, %v2943_v56 }
 0x546   :  { %v1329_v39 = vadd.f32 1.0, %v2945_v17 }
 0x547   :  { %2946 = vrcp.f32 %v1330_v26 }
 0x548   :  { %2948 = vpow2.f32 %v2258_v13  ;;  %v1360_v13 = vld [vmem:[#allocation4 + $0xb8] sm:$0xff] }
 0x549   :  { %2950 = vrcp.f32 %v1329_v39 }
 0x54a   :  { %2952 = vrcp.f32 %v1328_v40 }
 0x551   :  { %v2947_v49 = vpop.eup %2946 }
 0x552   :  { %v2949_v53 = vpop.eup %2948  ;;  %v1342_v1 = vmul.f32 2.0, %v2947_v49 }
 0x553   :  { %v2951_v2 = vpop.eup %2950  ;;  %v1331_v37 = vadd.f32 1.0, %v2949_v53 }
 0x554   :  { %v1346_v20 = vadd.f32 -1.0, %v1342_v1  ;;  %v2953_v36 = vpop.eup %2952  ;;  %v1349_v59 = vmul.f32 %v2951_v2, %v3455_v33  ;;  %v1357_v33 = vld [vmem:[#allocation4 + $0xa0] sm:$0xff] }
 0x555   :  { %2954 = vrcp.f32 %v1331_v37 }
 0x556   :  { %v1350_v47 = vmul.f32 %v2953_v36, %v1346_v20 }
 0x558   :  { %v3493_v48 = vadd.f32 %v1350_v47, %v1349_v59 }
 0x55a   :  { %2956 = vtanh.f32 %v3493_v48 }
 0x55f   :  { %v2955_v61 = vpop.eup %2954 }
 0x564   :  { %v2957_v62 = vpop.eup %2956 }
 0x565   :  { %v1353_v3 = vmul.f32 %v2957_v62, %v2955_v61 }
 0x567   :  { %1491 = vmatmul.mubr.f32.vlgmr.msra.gmra.mrb[10].mxu0 %v1353_v3  ;;  %1562 = vmatmul.mubr.f32.vlgmr.msra.gmra.mrb[10].mxu1 %v1353_v3 }
 0x568   :  { %2711 = vmatpush1.bf16.msra.mxu0 %v3360_v15  ;;  %2743 = vmatpush1.bf16.msra.mxu1 %v3363_v23 }
 0x569   :  { %2713 = vmatprep.subr.bf16.mxu0 %v3368_v30  ;;  %2745 = vmatprep.subr.bf16.mxu1 %v3370_v41 }
 0x56a   :  { %1746 = vmatprep.mubr.f32.mxu0 %v3088_v0  ;;  %1817 = vmatprep.mubr.f32.mxu1 %v3088_v0 }
 0x56c   :  { %2715 = vmatpush1.bf16.msra.mxu0 %v3372_v43  ;;  %2747 = vmatpush1.bf16.msra.mxu1 %v3375_v51 }
 0x56d   :  { %2717 = vmatprep.subr.bf16.mxu0 %v3380_v58  ;;  %2749 = vmatprep.subr.bf16.mxu1 %v3382_v18 }
 0x570   :  { %2719 = vmatpush1.bf16.msra.mxu0 %v3384_v22  ;;  %2751 = vmatpush1.bf16.msra.mxu1 %v3387_v34 }
 0x571   :  { %2721 = vmatprep.subr.bf16.mxu0 %v3392_v44  ;;  %2753 = vmatprep.subr.bf16.mxu1 %v3394_v57 }
 0x574   :  { %2723 = vmatpush1.bf16.msra.mxu0 %v3396_v63  ;;  %2755 = vmatpush1.bf16.msra.mxu1 %v3399_v7 }
 0x575   :  { %2725 = vmatprep.subr.bf16.mxu0 %v3404_v25  ;;  %2757 = vmatprep.subr.bf16.mxu1 %v3406_v42 }
 0x578   :  { %2727 = vmatpush1.bf16.msra.mxu0 %v3408_v46  ;;  %2759 = vmatpush1.bf16.msra.mxu1 %v3411_v60 }
 0x579   :  { %2729 = vmatprep.subr.bf16.mxu0 %v3415_v5  ;;  %2761 = vmatprep.subr.bf16.mxu1 %v3418_v14 }
 0x57c   :  { %2731 = vmatpush1.bf16.msra.mxu0 %v3420_v4  ;;  %2763 = vmatpush1.bf16.msra.mxu1 %v3423_v29 }
 0x57d   :  { %2733 = vmatprep.subr.bf16.mxu0 %v3426_v45  ;;  %2765 = vmatprep.subr.bf16.mxu1 %v3428_v50 }
 0x580   :  { %2735 = vmatpush1.bf16.msra.mxu0 %v3431_v8  ;;  %2767 = vmatpush1.bf16.msra.mxu1 %v3435_v27 }
 0x581   :  { %2737 = vmatprep.subr.bf16.mxu0 %v3437_v35  ;;  %2769 = vmatprep.subr.bf16.mxu1 %v3440_v52 }
 0x584   :  { %2739 = vmatpush1.bf16.msra.mxu0 %v3443_v16  ;;  %2771 = vmatpush1.bf16.msra.mxu1 %v3447_v19 }
 0x585   :  { %2773 = vmatprep.subr.bf16.mxu0 %v3356_v10  ;;  %2805 = vmatprep.subr.bf16.mxu1 %v3358_v9 }
 0x63a   :  { %v1492_v12 = vpop.f32.mrb[10].mxu0  ;;  %v1563_v21 = vpop.f32.mrb[10].mxu1 }
 0x63b   :  { %v1568_v24 = vadd.f32 %v1492_v12, %v1357_v33  ;;  %v1570_v28 = vadd.f32 %v1563_v21, %v1359_v6  ;;  %v1494_v31 = vpop.f32.mrb[11].mxu0  ;;  %v1565_v32 = vpop.f32.mrb[11].mxu1 }
 0x63c   :  { %v1569_v38 = vadd.f32 %v1494_v31, %v1358_v11  ;;  %v1571_v10 = vadd.f32 %v1565_v32, %v1360_v13  ;;  %v2128_v31 = vld [vmem:[%s3637_s2] sm:$0xff]  ;;  %v2129_v32 = vld [vmem:[%s3637_s2 + $0x8] sm:$0xff] }
 0x63d   :  { %v2259_v54 = vmul.f32 -1.442695, %v1568_v24  ;;  %v2261_v55 = vmul.f32 -1.442695, %v1570_v28 }
 0x63e   :  { %v2260_v56 = vmul.f32 -1.442695, %v1569_v38  ;;  %v2262_v26 = vmul.f32 -1.442695, %v1571_v10  ;;  %v2837_v38 = vpack.c.bf16 %v2129_v32, %v2128_v31  ;;  %v2132_v10 = vld [vmem:[%s3637_s2 + $0x20] sm:$0xff] }
 0x63f   :  { %2958 = vpow2.f32 %v2259_v54  ;;  %v3089_v54 = vmov 0.0|0.0  }
 0x640   :  { %2960 = vpow2.f32 %v2261_v55  ;;  %v2130_v55 = vld [vmem:[%s3637_s2 + $0x10] sm:$0xff] }
 0x641   :  { %2962 = vpow2.f32 %v2260_v56  ;;  %v2131_v56 = vld [vmem:[%s3637_s2 + $0x18] sm:$0xff] }
 0x642   :  { %v2840_v13 = vpack.c.bf16 %v2131_v56, %v2130_v55 }
 0x649   :  { %v2959_v17 = vpop.eup %2958 }
 0x64a   :  { %v2961_v9 = vpop.eup %2960  ;;  %v1584_v53 = vadd.f32 1.0, %v2959_v17  ;;  %v2133_v17 = vld [vmem:[%s3637_s2 + $0x28] sm:$0xff] }
 0x64b   :  { %v2963_v39 = vpop.eup %2962  ;;  %v1586_v40 = vadd.f32 1.0, %v2961_v9  ;;  %v2843_v9 = vpack.c.bf16 %v2133_v17, %v2132_v10 }
 0x64c   :  { %v1585_v49 = vadd.f32 1.0, %v2963_v39  ;;  %v2135_v39 = vld [vmem:[%s3637_s2 + $0x38] sm:$0xff] }
 0x64d   :  { %2964 = vrcp.f32 %v1586_v40 }
 0x64e   :  { %2966 = vpow2.f32 %v2262_v26  ;;  %v2134_v26 = vld [vmem:[%s3637_s2 + $0x30] sm:$0xff] }
 0x64f   :  { %2968 = vrcp.f32 %v1585_v49  ;;  %v2846_v40 = vpack.c.bf16 %v2135_v39, %v2134_v26  ;;  %v2136_v49 = vld [vmem:[%s3637_s2 + $0x40] sm:$0xff] }
 0x650   :  { %2970 = vrcp.f32 %v1584_v53  ;;  %v2137_v53 = vld [vmem:[%s3637_s2 + $0x48] sm:$0xff] }
 0x657   :  { %v2965_v1 = vpop.eup %2964 }
 0x658   :  { %v2967_v2 = vpop.eup %2966  ;;  %v1598_v20 = vmul.f32 2.0, %v2965_v1  ;;  %v2849_v1 = vpack.c.bf16 %v2137_v53, %v2136_v49 }
 0x659   :  { %v2969_v36 = vpop.eup %2968  ;;  %v1587_v59 = vadd.f32 1.0, %v2967_v2  ;;  %v2138_v2 = vld [vmem:[%s3637_s2 + $0x50] sm:$0xff] }
 0x65a   :  { %v1602_v37 = vadd.f32 -1.0, %v1598_v20  ;;  %v2971_v47 = vpop.eup %2970  ;;  %v1605_v62 = vmul.f32 %v2969_v36, %v3493_v48  ;;  %v2139_v20 = vld [vmem:[%s3637_s2 + $0x58] sm:$0xff]  ;;  %v2140_v36 = vld [vmem:[%s3637_s2 + $0x60] sm:$0xff] }
 0x65b   :  { %2972 = vrcp.f32 %v1587_v59 }
 0x65c   :  { %v1606_v61 = vmul.f32 %v2971_v47, %v1602_v37  ;;  %v2852_v37 = vpack.c.bf16 %v2139_v20, %v2138_v2  ;;  %v2141_v47 = vld [vmem:[%s3637_s2 + $0x68] sm:$0xff] }
 0x65d   :  { %v2855_v59 = vpack.c.bf16 %v2141_v47, %v2140_v36 }
 0x65e   :  { %v3531_v3 = vadd.f32 %v1606_v61, %v1605_v62  ;;  %v2142_v61 = vld [vmem:[%s3637_s2 + $0x70] sm:$0xff]  ;;  %v2143_v62 = vld [vmem:[%s3637_s2 + $0x78] sm:$0xff] }
 0x660   :  { %2974 = vtanh.f32 %v3531_v3 }
 0x665   :  { %v2973_v33 = vpop.eup %2972 }
 0x66a   :  { %v2975_v6 = vpop.eup %2974 }
 0x66b   :  { %v1609_v11 = vmul.f32 %v2975_v6, %v2973_v33  ;;  %v1869_v33 = vld [vmem:[#allocation4 + $0xe0] sm:$0xff]  ;;  %v1871_v6 = vld [vmem:[#allocation4 + $0xf0] sm:$0xff] }
 0x66d   :  { %1747 = vmatmul.mubr.f32.vlgmr.msra.gmra.mrb[12].mxu0 %v1609_v11  ;;  %1818 = vmatmul.mubr.f32.vlgmr.msra.gmra.mrb[12].mxu1 %v1609_v11  ;;  %v1870_v11 = vld [vmem:[#allocation4 + $0xe8] sm:$0xff] }
 0x66e   :  { %2775 = vmatpush1.bf16.msra.mxu0 %v3360_v15  ;;  %2807 = vmatpush1.bf16.msra.mxu1 %v3363_v23  ;;  %v1613_v15 = vld [vmem:[#allocation4 + $0xc0] sm:$0xff]  ;;  %v1615_v23 = vld [vmem:[#allocation4 + $0xd0] sm:$0xff] }
 0x66f   :  { %2777 = vmatprep.subr.bf16.mxu0 %v3368_v30  ;;  %2809 = vmatprep.subr.bf16.mxu1 %v3370_v41  ;;  %v1614_v30 = vld [vmem:[#allocation4 + $0xc8] sm:$0xff] }
 0x670   :  { %2002 = vmatprep.mubr.f32.mxu0 %v3088_v0  ;;  %2073 = vmatprep.mubr.f32.mxu1 %v3088_v0 }
 0x672   :  { %2779 = vmatpush1.bf16.msra.mxu0 %v3372_v43  ;;  %2811 = vmatpush1.bf16.msra.mxu1 %v3375_v51 }
 0x673   :  { %2781 = vmatprep.subr.bf16.mxu0 %v3380_v58  ;;  %2813 = vmatprep.subr.bf16.mxu1 %v3382_v18 }
 0x676   :  { %2783 = vmatpush1.bf16.msra.mxu0 %v3384_v22  ;;  %2815 = vmatpush1.bf16.msra.mxu1 %v3387_v34 }
 0x677   :  { %2785 = vmatprep.subr.bf16.mxu0 %v3392_v44  ;;  %2817 = vmatprep.subr.bf16.mxu1 %v3394_v57 }
 0x67a   :  { %2787 = vmatpush1.bf16.msra.mxu0 %v3396_v63  ;;  %2819 = vmatpush1.bf16.msra.mxu1 %v3399_v7  ;;  %v1616_v7 = vld [vmem:[#allocation4 + $0xd8] sm:$0xff] }
 0x67b   :  { %2789 = vmatprep.subr.bf16.mxu0 %v3404_v25  ;;  %2821 = vmatprep.subr.bf16.mxu1 %v3406_v42 }
 0x67e   :  { %2791 = vmatpush1.bf16.msra.mxu0 %v3408_v46  ;;  %2823 = vmatpush1.bf16.msra.mxu1 %v3411_v60 }
 0x67f   :  { %2793 = vmatprep.subr.bf16.mxu0 %v3415_v5  ;;  %2825 = vmatprep.subr.bf16.mxu1 %v3418_v14 }
 0x682   :  { %2795 = vmatpush1.bf16.msra.mxu0 %v3420_v4  ;;  %2827 = vmatpush1.bf16.msra.mxu1 %v3423_v29 }
 0x683   :  { %2797 = vmatprep.subr.bf16.mxu0 %v3426_v45  ;;  %2829 = vmatprep.subr.bf16.mxu1 %v3428_v50 }
 0x686   :  { %2799 = vmatpush1.bf16.msra.mxu0 %v3431_v8  ;;  %2831 = vmatpush1.bf16.msra.mxu1 %v3435_v27 }
 0x687   :  { %2801 = vmatprep.subr.bf16.mxu0 %v3437_v35  ;;  %2833 = vmatprep.subr.bf16.mxu1 %v3440_v52 }
 0x68a   :  { %2803 = vmatpush1.bf16.msra.mxu0 %v3443_v16  ;;  %2835 = vmatpush1.bf16.msra.mxu1 %v3447_v19 }
 0x68b   :  { %2836 = vmatprep.subr.bf16.mxu0 %v3089_v54 }
 0x740   :  { %v1748_v41 = vpop.f32.mrb[12].mxu0  ;;  %v1819_v43 = vpop.f32.mrb[12].mxu1 }
 0x741   :  { %v1824_v51 = vadd.f32 %v1748_v41, %v1613_v15  ;;  %v1826_v58 = vadd.f32 %v1819_v43, %v1615_v23  ;;  %v1750_v18 = vpop.f32.mrb[13].mxu0  ;;  %v1821_v22 = vpop.f32.mrb[13].mxu1 }
 0x742   :  { %v1825_v34 = vadd.f32 %v1750_v18, %v1614_v30  ;;  %v1827_v25 = vadd.f32 %v1821_v22, %v1616_v7 }
 0x743   :  { %v2263_v44 = vmul.f32 -1.442695, %v1824_v51  ;;  %v2265_v57 = vmul.f32 -1.442695, %v1826_v58 }
 0x744   :  { %v2264_v63 = vmul.f32 -1.442695, %v1825_v34  ;;  %v2266_v60 = vmul.f32 -1.442695, %v1827_v25  ;;  %v1872_v34 = vld [vmem:[#allocation4 + $0xf8] sm:$0xff] }
 0x745   :  { %2976 = vpow2.f32 %v2263_v44 }
 0x746   :  { %2978 = vpow2.f32 %v2265_v57 }
 0x747   :  { %2980 = vpow2.f32 %v2264_v63 }
 0x74f   :  { %v2977_v42 = vpop.eup %2976 }
 0x750   :  { %v2979_v46 = vpop.eup %2978  ;;  %v1840_v29 = vadd.f32 1.0, %v2977_v42 }
 0x751   :  { %v2981_v5 = vpop.eup %2980  ;;  %v1842_v14 = vadd.f32 1.0, %v2979_v46 }
 0x752   :  { %v1841_v4 = vadd.f32 1.0, %v2981_v5 }
 0x753   :  { %2982 = vrcp.f32 %v1842_v14 }
 0x754   :  { %2984 = vpow2.f32 %v2266_v60 }
 0x755   :  { %2986 = vrcp.f32 %v1841_v4 }
 0x756   :  { %2988 = vrcp.f32 %v1840_v29 }
 0x75d   :  { %v2983_v45 = vpop.eup %2982 }
 0x75e   :  { %v2985_v50 = vpop.eup %2984  ;;  %v1854_v8 = vmul.f32 2.0, %v2983_v45 }
 0x75f   :  { %v2987_v27 = vpop.eup %2986  ;;  %v1843_v16 = vadd.f32 1.0, %v2985_v50 }
 0x760   :  { %v1858_v35 = vadd.f32 -1.0, %v1854_v8  ;;  %v2989_v52 = vpop.eup %2988  ;;  %v1861_v48 = vmul.f32 %v2987_v27, %v3531_v3  ;;  %v2858_v3 = vpack.c.bf16 %v2143_v62, %v2142_v61 }
 0x761   :  { %2990 = vrcp.f32 %v1843_v16 }
 0x762   :  { %v1862_v19 = vmul.f32 %v2989_v52, %v1858_v35 }
 0x764   :  { %v3567_v12 = vadd.f32 %v1862_v19, %v1861_v48 }
 0x766   :  { %2992 = vtanh.f32 %v3567_v12 }
 0x76b   :  { %v2991_v21 = vpop.eup %2990 }
 0x770   :  { %v2993_v24 = vpop.eup %2992 }
 0x771   :  { %v1865_v28 = vmul.f32 %v2993_v24, %v2991_v21  ;;  %v2271_v21 = vld [vmem:[%s3638_s3] ss:$0 sm:$0xff] }
 0x773   :  { %2003 = vmatmul.mubr.f32.vlgmr.msra.gmra.mrb[14].mxu0 %v1865_v28  ;;  %2074 = vmatmul.mubr.f32.vlgmr.msra.gmra.mrb[14].mxu1 %v1865_v28 }
 0x774   :  { %2838 = vmatpush3.bf16.msra.mxu0 %v2837_v38  ;;  %2321 = vmatprep.mubr.msk.f32.mxu0 %vm3090_vm0, %v3088_v0 }
 0x775   :  { %2839 = vmatprep.subr.bf16.mxu0 %v3089_v54 }
 0x778   :  { %2841 = vmatpush3.bf16.msra.mxu0 %v2840_v13 }
 0x779   :  { %2842 = vmatprep.subr.bf16.mxu0 %v3089_v54 }
 0x77c   :  { %2844 = vmatpush3.bf16.msra.mxu0 %v2843_v9 }
 0x77d   :  { %2845 = vmatprep.subr.bf16.mxu0 %v3089_v54 }
 0x780   :  { %2847 = vmatpush3.bf16.msra.mxu0 %v2846_v40 }
 0x781   :  { %2848 = vmatprep.subr.bf16.mxu0 %v3089_v54 }
 0x784   :  { %2850 = vmatpush3.bf16.msra.mxu0 %v2849_v1 }
 0x785   :  { %2851 = vmatprep.subr.bf16.mxu0 %v3089_v54 }
 0x788   :  { %2853 = vmatpush3.bf16.msra.mxu0 %v2852_v37 }
 0x789   :  { %2854 = vmatprep.subr.bf16.mxu0 %v3089_v54 }
 0x78c   :  { %2856 = vmatpush3.bf16.msra.mxu0 %v2855_v59 }
 0x78d   :  { %2857 = vmatprep.subr.bf16.mxu0 %v3089_v54 }
 0x790   :  { %2859 = vmatpush3.bf16.msra.mxu0 %v2858_v3 }
 0x846   :  { %v2004_v15 = vpop.f32.mrb[14].mxu0  ;;  %v2075_v0 = vpop.f32.mrb[14].mxu1 }
 0x847   :  { %v2080_v23 = vadd.f32 %v2004_v15, %v1869_v33  ;;  %v2082_v30 = vadd.f32 %v2075_v0, %v1871_v6  ;;  %v2006_v41 = vpop.f32.mrb[15].mxu0  ;;  %v2077_v43 = vpop.f32.mrb[15].mxu1 }
 0x848   :  { %v2081_v51 = vadd.f32 %v2006_v41, %v1870_v11  ;;  %v2083_v44 = vadd.f32 %v2077_v43, %v1872_v34 }
 0x849   :  { %v2267_v58 = vmul.f32 -1.442695, %v2080_v23  ;;  %v2269_v18 = vmul.f32 -1.442695, %v2082_v30 }
 0x84a   :  { %v2268_v22 = vmul.f32 -1.442695, %v2081_v51  ;;  %v2270_v7 = vmul.f32 -1.442695, %v2083_v44 }
 0x84b   :  { %2994 = vpow2.f32 %v2267_v58 }
 0x84c   :  { %2996 = vpow2.f32 %v2269_v18 }
 0x84d   :  { %2998 = vpow2.f32 %v2268_v22 }
 0x855   :  { %v2995_v57 = vpop.eup %2994 }
 0x856   :  { %v2997_v63 = vpop.eup %2996  ;;  %v2096_v60 = vadd.f32 1.0, %v2995_v57 }
 0x857   :  { %v2999_v25 = vpop.eup %2998  ;;  %v2098_v42 = vadd.f32 1.0, %v2997_v63 }
 0x858   :  { %v2097_v46 = vadd.f32 1.0, %v2999_v25 }
 0x859   :  { %3000 = vrcp.f32 %v2098_v42 }
 0x85a   :  { %3002 = vpow2.f32 %v2270_v7 }
 0x85b   :  { %3004 = vrcp.f32 %v2097_v46 }
 0x85c   :  { %3006 = vrcp.f32 %v2096_v60 }
 0x863   :  { %v3001_v5 = vpop.eup %3000 }
 0x864   :  { %v3003_v14 = vpop.eup %3002  ;;  %v2110_v4 = vmul.f32 2.0, %v3001_v5 }
 0x865   :  { %v3005_v29 = vpop.eup %3004  ;;  %v2099_v8 = vadd.f32 1.0, %v3003_v14 }
 0x866   :  { %v2114_v45 = vadd.f32 -1.0, %v2110_v4  ;;  %v3007_v50 = vpop.eup %3006  ;;  %v2117_v35 = vmul.f32 %v3005_v29, %v3567_v12 }
 0x867   :  { %3008 = vrcp.f32 %v2099_v8 }
 0x868   :  { %v2118_v27 = vmul.f32 %v3007_v50, %v2114_v45 }
 0x86a   :  { %v2119_v52 = vadd.f32 %v2118_v27, %v2117_v35 }
 0x86c   :  { %3010 = vtanh.f32 %v2119_v52 }
 0x871   :  { %v3009_v16 = vpop.eup %3008 }
 0x876   :  { %v3011_v19 = vpop.eup %3010 }
 0x877   :  { %v2121_v48 = vmul.f32 %v3011_v19, %v3009_v16 }
 0x879   :  { %2322 = vmatmul.mubr.f32.vlgmr.msra.gmra.mrb[16].mxu0 %v2121_v48 }
 0x94c   :  { %v2217_v24 = vpop.f32.mrb[16].mxu0 }
 0x94d   :  { %v2218_v28 = vadd.f32 %v2271_v21, %v2217_v24  ;;  %v2323_v31 = vpop.f32.mrb[17].mxu0 }
 0x94f   :  { %2222 = vst.msk [vmem:[#allocation9] sm:$0xff] %vm2221_vm1, %v2218_v28 }
 0x950   :  { %3067 = shalt.err (!%p3064_p6)
}
 0x951   :  { %s3068_s23 = scalar_lea.hbm %s3639_s4, 128 }
 0x952   :  { %p3069_p7 = scmp.ne.s32.totalorder %s3639_s4, %s3068_s23  ;;  %p3072_p8 = scmp.lt.u32.totalorder %s3068_s23, %s3639_s4 }
 0x954   :  { %p3074_p9 = pnand %p3072_p8, %p3069_p7 }
 0x956   :  { %3077 = shalt.err (!%p3074_p9)
}
 0x957   :  { %2232 = dma.vmem_to_hbm [thread:$0]  %s2230_s19, 128, %s3639_s4, [#allocation6]  }
 0x958   :  { %3082 = dma.done.wait [#allocation6], 128  }
 0x959   :  { %3083 = vsyncadd [#allocation6], 4294967168 }
 0x95a   :  { %2236 = vsyncpa [#allocation5], 1 }
 0x95b   :  { %2237 = vsyncpa [#allocation8], 1 }
 0x95c   :  { %2238 = vsyncpa [#allocation6], 1 }

</bundles_post_ra>
